<compile_context>
chip_gen: v5e
topology: v5e:2x2
jax: 0.10.0
libtpu: 0.0.40
codegen_flags: <defaults>
</compile_context>

<pallas_src>
import functools

import numpy as np
import jax
import jax.numpy as jnp
from jax.experimental import pallas as pl
from jax.experimental.pallas import tpu as pltpu


# ----------------------------------------------------------------------------
# Kernel 1: conv1 -> avgpool1 -> conv2 -> avgpool2, IMG images per grid step.
# ----------------------------------------------------------------------------
def _convnet_kernel(x_ref, wb1_ref, b1_ref, rp1_ref, cp1_ref,
                    wb2_ref, b2_ref, rp2_ref, cp2_ref, o_ref, *, img):
    f32 = jnp.float32

    x = x_ref[...]                                            # (IMG, 40, 128) bf16

    # ---- conv1 as a banded matmul: concat the 5 row-shifted slices along ----
    # ---- lanes (128-aligned -> no lane shuffles), one MXU hit per step.  ----
    p1 = jnp.concatenate(
        [jnp.concatenate([x[g, ki:ki + 32, :] for ki in range(5)], axis=1)
         for g in range(img)], axis=0)                        # (IMG*32, 640) bf16
    y1 = jnp.dot(p1, wb1_ref[...], preferred_element_type=f32) + b1_ref[...]
    # y1: (IMG*32, 256) f32, row = conv1 row i, lane = j*8 + cout

    # ---- avgpool1 (2x2): tiny row-pair matmul + 256->128 lane compaction ----
    a1 = jnp.dot(jnp.dot(rp1_ref[...], y1, preferred_element_type=f32),
                 cp1_ref[...], preferred_element_type=f32)    # (IMG*24, 128) f32
    a1 = a1.astype(jnp.bfloat16)

    # ---- conv2 as a banded matmul over the pooled map (lane = j1*8 + cin) ---
    p2 = jnp.concatenate(
        [jnp.concatenate(
            [a1[g * 24 + ki:g * 24 + ki + 16, :] for ki in range(5)], axis=1)
         for g in range(img)], axis=0)                        # (IMG*16, 640) bf16
    y2 = jnp.dot(p2, wb2_ref[...], preferred_element_type=f32) + b2_ref[...]
    # y2: (IMG*16, 256) f32, row = conv2 row i2, lane = j2*16 + cout

    # ---- avgpool2 (2x2): same tiny-matmul trick --------------------------------
    a2 = jnp.dot(jnp.dot(rp2_ref[...], y2, preferred_element_type=f32),
                 cp2_ref[...], preferred_element_type=f32)    # (IMG*8, 128) f32

    o_ref[...] = a2.reshape(img, 8, 128).astype(o_ref.dtype)


# ----------------------------------------------------------------------------
# Kernel 2: fc1 -> ReLU -> fc2 -> ReLU -> fc3 (all widths padded to 128 lanes)
# ----------------------------------------------------------------------------
def _mlp_kernel(x_ref, w1_ref, b1_ref, w2_ref, b2_ref, w3_ref, b3_ref, o_ref):
    f32 = jnp.float32
    h = jnp.dot(x_ref[...], w1_ref[...], preferred_element_type=f32) + b1_ref[...]
    h = jnp.maximum(h, 0.0).astype(jnp.bfloat16)
    h = jnp.dot(h, w2_ref[...], preferred_element_type=f32) + b2_ref[...]
    h = jnp.maximum(h, 0.0).astype(jnp.bfloat16)
    o_ref[...] = jnp.dot(h, w3_ref[...], preferred_element_type=f32) + b3_ref[...]


# ----------------------------------------------------------------------------
# One-time constant packing (host side, NumPy)
# ----------------------------------------------------------------------------
def prepare_constants(params, img_per_step):
    img = img_per_step
    f32 = np.float32

    w1 = np.asarray(params["conv1_w"], f32)       # (6, 3, 5, 5)  (Cout, Cin, kh, kw)
    b1 = np.asarray(params["conv1_b"], f32)
    w2 = np.asarray(params["conv2_w"], f32)       # (16, 6, 5, 5)
    b2 = np.asarray(params["conv2_b"], f32)

    # conv1 banded weight: row = ki*128 + (jin*3 + cin), col = jout*8 + cout.
    wb1 = np.zeros((5 * 128, 256), f32)
    for ki in range(5):
        for kj in range(5):
            wkk = w1[:, :, ki, kj].T                          # (cin=3, cout=6)
            for j in range(28):
                r = ki * 128 + (j + kj) * 3
                wb1[r:r + 3, j * 8:j * 8 + 6] = wkk
    b1row = np.zeros((1, 256), f32)
    for j in range(28):
        b1row[0, j * 8:j * 8 + 6] = b1

    # conv2 banded weight: row = ki*128 + (j1*8 + cin), col = j2*16 + cout.
    wb2 = np.zeros((5 * 128, 256), f32)
    for ki in range(5):
        for kj in range(5):
            wkk = w2[:, :, ki, kj].T                          # (cin=6, cout=16)
            for j2 in range(10):
                r = ki * 128 + (j2 + kj) * 8
                wb2[r:r + 6, j2 * 16:j2 * 16 + 16] = wkk
    b2row = np.zeros((1, 256), f32)
    for j2 in range(10):
        b2row[0, j2 * 16:j2 * 16 + 16] = b2

    # 2x2 avg-pool matrices (tiny): rp* sums row pairs (block-diagonal across
    # the IMG images packed into one grid step); cp* sums lane pairs and
    # compacts 256 -> 128 lanes.  The 1/4 scale lives in cp*.
    rp1 = np.zeros((img * 24, img * 32), f32)
    for g in range(img):
        for i1 in range(14):
            rp1[g * 24 + i1, g * 32 + 2 * i1] = 1.0
            rp1[g * 24 + i1, g * 32 + 2 * i1 + 1] = 1.0
    cp1 = np.zeros((256, 128), f32)
    for j1 in range(14):
        for d in range(2):
            for c in range(6):
                cp1[(2 * j1 + d) * 8 + c, j1 * 8 + c] = 0.25

    rp2 = np.zeros((img * 8, img * 16), f32)
    for g in range(img):
        for i3 in range(5):
            rp2[g * 8 + i3, g * 16 + 2 * i3] = 1.0
            rp2[g * 8 + i3, g * 16 + 2 * i3 + 1] = 1.0
    cp2 = np.zeros((256, 128), f32)
    for j3 in range(5):
        for d in range(2):
            for c in range(16):
                cp2[(2 * j3 + d) * 16 + c, j3 * 16 + c] = 0.25

    # fc1: fold the PyTorch CHW flatten order (f = c*25 + i*5 + j) into the
    # weight rows so the feature layout r = i*128 + j*16 + c feeds it directly.
    f1 = np.asarray(params["fc1_w"], f32)                     # (120, 400)
    t = f1.reshape(120, 16, 5, 5)                             # [n, c, i, j]
    wf1 = np.zeros((8, 8, 16, 128), f32)
    wf1[:5, :5, :, :120] = np.transpose(t, (2, 3, 1, 0))      # [i, j, c, n]
    wf1 = wf1.reshape(1024, 128)
    bf1 = np.zeros((1, 128), f32)
    bf1[0, :120] = np.asarray(params["fc1_b"], f32)

    wf2 = np.zeros((128, 128), f32)
    wf2[:120, :84] = np.asarray(params["fc2_w"], f32).T
    bf2 = np.zeros((1, 128), f32)
    bf2[0, :84] = np.asarray(params["fc2_b"], f32)

    wf3 = np.zeros((128, 128), f32)
    wf3[:84, :11] = np.asarray(params["fc3_w"], f32).T
    bf3 = np.zeros((1, 128), f32)
    bf3[0, :11] = np.asarray(params["fc3_b"], f32)

    bf16 = jnp.bfloat16
    return {
        "wb1": jnp.asarray(wb1, bf16), "b1": jnp.asarray(b1row),
        "rp1": jnp.asarray(rp1), "cp1": jnp.asarray(cp1),
        "wb2": jnp.asarray(wb2, bf16), "b2": jnp.asarray(b2row),
        "rp2": jnp.asarray(rp2), "cp2": jnp.asarray(cp2),
        "wf1": jnp.asarray(wf1, bf16), "bf1": jnp.asarray(bf1),
        "wf2": jnp.asarray(wf2, bf16), "bf2": jnp.asarray(bf2),
        "wf3": jnp.asarray(wf3, bf16), "bf3": jnp.asarray(bf3),
    }


# ----------------------------------------------------------------------------
# Parameters (deterministic synthetic init, PyTorch-shaped)
# ----------------------------------------------------------------------------
def init_params(key):
    ks = jax.random.split(key, 10)

    def rnd(k, shape, fan_in):
        return (jax.random.normal(k, shape, jnp.float32) / jnp.sqrt(fan_in)).astype(jnp.float32)

    return {
        "conv1_w": rnd(ks[0], (6, 3, 5, 5), 3 * 5 * 5),
        "conv1_b": rnd(ks[1], (6,), 3 * 5 * 5),
        "conv2_w": rnd(ks[2], (16, 6, 5, 5), 6 * 5 * 5),
        "conv2_b": rnd(ks[3], (16,), 6 * 5 * 5),
        "fc1_w": rnd(ks[4], (120, 400), 400),
        "fc1_b": rnd(ks[5], (120,), 400),
        "fc2_w": rnd(ks[6], (84, 120), 120),
        "fc2_b": rnd(ks[7], (84,), 120),
        "fc3_w": rnd(ks[8], (11, 84), 84),
        "fc3_b": rnd(ks[9], (11,), 84),
    }


# ----------------------------------------------------------------------------
# Forward pass (matches lenet5.forward semantics)
# ----------------------------------------------------------------------------
@functools.partial(jax.jit, static_argnames=("img_per_step",))
def lenet5_forward(consts, x_nchw, *, img_per_step):
    img = img_per_step
    b = x_nchw.shape[0]

    # Image to lane-dense layout: rows = H (padded 32->40), lanes = W*C (96->128).
    x = jnp.transpose(x_nchw, (0, 2, 3, 1)).reshape(b, 32, 96)
    x = jnp.pad(x, ((0, 0), (0, 8), (0, 32))).astype(jnp.bfloat16)   # (B, 40, 128)

    b_pad1 = ((b + img - 1) // img) * img
    if b_pad1 != b:
        x = jnp.pad(x, ((0, b_pad1 - b), (0, 0), (0, 0)))

    const = lambda shape: pl.BlockSpec(shape, lambda i: (0, 0))

    # --- fused conv/pool stack, IMG images per grid step ---------------------
    feat3 = pl.pallas_call(
        functools.partial(_convnet_kernel, img=img),
        out_shape=jax.ShapeDtypeStruct((b_pad1, 8, 128), jnp.bfloat16),
        grid=(b_pad1 // img,),
        in_specs=[
            pl.BlockSpec((img, 40, 128), lambda i: (i, 0, 0)),
            const((640, 256)), const((1, 256)),                 # conv1 band + bias
            const((img * 24, img * 32)), const((256, 128)),     # pool1 row/col
            const((640, 256)), const((1, 256)),                 # conv2 band + bias
            const((img * 8, img * 16)), const((256, 128)),      # pool2 row/col
        ],
        out_specs=pl.BlockSpec((img, 8, 128), lambda i: (i, 0, 0)),
        compiler_params=pltpu.CompilerParams(
            dimension_semantics=("parallel",)),
    )(x, consts["wb1"], consts["b1"], consts["rp1"], consts["cp1"],
      consts["wb2"], consts["b2"], consts["rp2"], consts["cp2"])

    # --- flatten: free reshape; CHW flatten order is folded into fc1 weights -
    feat = feat3.reshape(b_pad1, 1024)

    bm = min(128, ((b + 7) // 8) * 8)
    b_pad2 = ((b + bm - 1) // bm) * bm
    if b_pad2 > b_pad1:
        feat = jnp.pad(feat, ((0, b_pad2 - b_pad1), (0, 0)))
    elif b_pad2 < b_pad1:
        feat = feat[:b_pad2]

    # --- fused MLP, batch row-tiles, weights VMEM-resident --------------------
    logits_pad = pl.pallas_call(
        _mlp_kernel,
        out_shape=jax.ShapeDtypeStruct((b_pad2, 128), jnp.float32),
        grid=(b_pad2 // bm,),
        in_specs=[
            pl.BlockSpec((bm, 1024), lambda i: (i, 0)),
            const((1024, 128)), const((1, 128)),
            const((128, 128)), const((1, 128)),
            const((128, 128)), const((1, 128)),
        ],
        out_specs=pl.BlockSpec((bm, 128), lambda i: (i, 0)),
        compiler_params=pltpu.CompilerParams(
            dimension_semantics=("parallel",)),
    )(feat, consts["wf1"], consts["bf1"], consts["wf2"], consts["bf2"],
      consts["wf3"], consts["bf3"])

    return logits_pad[:b, :11]                                     # (B, 11)


# ----------------------------------------------------------------------------
# Pure-JAX reference (f32) for a numerical sanity check
# ----------------------------------------------------------------------------
@jax.jit
def _reference_forward(params, x):
    dn = ("NCHW", "OIHW", "NCHW")
    y = jax.lax.conv_general_dilated(x, params["conv1_w"], (1, 1), "VALID",
                                     dimension_numbers=dn)
    y = y + params["conv1_b"].reshape(1, 6, 1, 1)
    y = jax.lax.reduce_window(y, 0.0, jax.lax.add, (1, 1, 2, 2), (1, 1, 2, 2),
                              "VALID") * 0.25
    y = jax.lax.conv_general_dilated(y, params["conv2_w"], (1, 1), "VALID",
                                     dimension_numbers=dn)
    y = y + params["conv2_b"].reshape(1, 16, 1, 1)
    y = jax.lax.reduce_window(y, 0.0, jax.lax.add, (1, 1, 2, 2), (1, 1, 2, 2),
                              "VALID") * 0.25
    f = y.reshape(x.shape[0], 400)
    h = jnp.maximum(f @ params["fc1_w"].T + params["fc1_b"], 0.0)
    h = jnp.maximum(h @ params["fc2_w"].T + params["fc2_b"], 0.0)
    return h @ params["fc3_w"].T + params["fc3_b"]


if __name__ == "__main__":
    key = jax.random.PRNGKey(0)
    pkey, xkey = jax.random.split(key)
    params = init_params(pkey)

    batch = 2
    # Spatial size must be 32x32 / 3 channels so the flatten matches 16*5*5=400.
    x = jax.random.normal(xkey, (batch, 3, 32, 32), jnp.float32)

    # >=2 grid steps when the batch allows (v7x megacore); 4 images/step for
    # larger batches to amortize per-grid-step overhead.
    img_per_step = max(1, min(4, batch // 2))
    consts = prepare_constants(params, img_per_step)

    logits = lenet5_forward(consts, x, img_per_step=img_per_step)
    logits = jax.block_until_ready(logits)

    assert logits.shape == (batch, 11) and logits.dtype == jnp.float32
    assert bool(jnp.all(jnp.isfinite(logits)))

    ref = jax.block_until_ready(_reference_forward(params, x))
    np.testing.assert_allclose(np.asarray(logits), np.asarray(ref),
                               rtol=0.1, atol=0.1)

    print("KERNEL_OK")
</pallas_src>

<mosaic_0001>
module attributes {stable_mosaic.version = 11 : i64} {
  func.func @_mlp_kernel(%arg0: i32, %arg1: memref<8x1024xbf16, #tpu.memory_space<vmem>>, %arg2: memref<1024x128xbf16, #tpu.memory_space<vmem>>, %arg3: memref<1x128xf32, #tpu.memory_space<vmem>>, %arg4: memref<128x128xbf16, #tpu.memory_space<vmem>>, %arg5: memref<1x128xf32, #tpu.memory_space<vmem>>, %arg6: memref<128x128xbf16, #tpu.memory_space<vmem>>, %arg7: memref<1x128xf32, #tpu.memory_space<vmem>>, %arg8: memref<8x128xf32, #tpu.memory_space<vmem>>) attributes {dimension_semantics = [#tpu.dimension_semantics<parallel>], iteration_bounds = array<i64: 1>, scalar_prefetch = 0 : i64, scratch_operands = 0 : i64, tpu.core_type = #tpu.core_type<tc>, window_params = [{transform_indices = @transform_0, window_bounds = array<i64: 8, 1024>}, {pipeline_mode = #tpu.pipeline_mode<synchronous>, transform_indices = @transform_1, window_bounds = array<i64: 1024, 128>}, {pipeline_mode = #tpu.pipeline_mode<synchronous>, transform_indices = @transform_2, window_bounds = array<i64: 1, 128>}, {pipeline_mode = #tpu.pipeline_mode<synchronous>, transform_indices = @transform_3, window_bounds = array<i64: 128, 128>}, {pipeline_mode = #tpu.pipeline_mode<synchronous>, transform_indices = @transform_4, window_bounds = array<i64: 1, 128>}, {pipeline_mode = #tpu.pipeline_mode<synchronous>, transform_indices = @transform_5, window_bounds = array<i64: 128, 128>}, {pipeline_mode = #tpu.pipeline_mode<synchronous>, transform_indices = @transform_6, window_bounds = array<i64: 1, 128>}, {transform_indices = @transform_7, window_bounds = array<i64: 8, 128>}]} {
    %c0 = arith.constant 0 : index
    %c0_0 = arith.constant 0 : index
    %0 = vector.load %arg1[%c0, %c0_0] : memref<8x1024xbf16, #tpu.memory_space<vmem>>, vector<8x1024xbf16>
    %c0_1 = arith.constant 0 : index
    %c0_2 = arith.constant 0 : index
    %1 = vector.load %arg2[%c0_1, %c0_2] : memref<1024x128xbf16, #tpu.memory_space<vmem>>, vector<1024x128xbf16>
    %cst = arith.constant dense<0.000000e+00> : vector<8x128xf32>
    %2 = tpu.matmul %0, %1, %cst {dimension_numbers = #tpu.dot_dimension_numbers<[1], [0], [0], [1], [0, 0, 1, 1], [], []>} : vector<8x1024xbf16>, vector<1024x128xbf16>, vector<8x128xf32> -> vector<8x128xf32>
    %c0_3 = arith.constant 0 : index
    %c0_4 = arith.constant 0 : index
    %3 = vector.load %arg3[%c0_3, %c0_4] : memref<1x128xf32, #tpu.memory_space<vmem>>, vector<1x128xf32>
    %4 = vector.broadcast %3 : vector<1x128xf32> to vector<8x128xf32>
    %5 = arith.addf %2, %4 : vector<8x128xf32>
    %cst_5 = arith.constant 0.000000e+00 : f32
    %6 = vector.broadcast %cst_5 : f32 to vector<8x128xf32>
    %7 = arith.maximumf %5, %6 : vector<8x128xf32>
    %8 = arith.truncf %7 : vector<8x128xf32> to vector<8x128xbf16>
    %c0_6 = arith.constant 0 : index
    %c0_7 = arith.constant 0 : index
    %9 = vector.load %arg4[%c0_6, %c0_7] : memref<128x128xbf16, #tpu.memory_space<vmem>>, vector<128x128xbf16>
    %cst_8 = arith.constant dense<0.000000e+00> : vector<8x128xf32>
    %10 = tpu.matmul %8, %9, %cst_8 {dimension_numbers = #tpu.dot_dimension_numbers<[1], [0], [0], [1], [0, 0, 1, 1], [], []>} : vector<8x128xbf16>, vector<128x128xbf16>, vector<8x128xf32> -> vector<8x128xf32>
    %c0_9 = arith.constant 0 : index
    %c0_10 = arith.constant 0 : index
    %11 = vector.load %arg5[%c0_9, %c0_10] : memref<1x128xf32, #tpu.memory_space<vmem>>, vector<1x128xf32>
    %12 = vector.broadcast %11 : vector<1x128xf32> to vector<8x128xf32>
    %13 = arith.addf %10, %12 : vector<8x128xf32>
    %cst_11 = arith.constant 0.000000e+00 : f32
    %14 = vector.broadcast %cst_11 : f32 to vector<8x128xf32>
    %15 = arith.maximumf %13, %14 : vector<8x128xf32>
    %16 = arith.truncf %15 : vector<8x128xf32> to vector<8x128xbf16>
    %c0_12 = arith.constant 0 : index
    %c0_13 = arith.constant 0 : index
    %17 = vector.load %arg6[%c0_12, %c0_13] : memref<128x128xbf16, #tpu.memory_space<vmem>>, vector<128x128xbf16>
    %cst_14 = arith.constant dense<0.000000e+00> : vector<8x128xf32>
    %18 = tpu.matmul %16, %17, %cst_14 {dimension_numbers = #tpu.dot_dimension_numbers<[1], [0], [0], [1], [0, 0, 1, 1], [], []>} : vector<8x128xbf16>, vector<128x128xbf16>, vector<8x128xf32> -> vector<8x128xf32>
    %c0_15 = arith.constant 0 : index
    %c0_16 = arith.constant 0 : index
    %19 = vector.load %arg7[%c0_15, %c0_16] : memref<1x128xf32, #tpu.memory_space<vmem>>, vector<1x128xf32>
    %20 = vector.broadcast %19 : vector<1x128xf32> to vector<8x128xf32>
    %21 = arith.addf %18, %20 : vector<8x128xf32>
    %c0_17 = arith.constant 0 : index
    %c0_18 = arith.constant 0 : index
    %22 = vector.load %arg8[%c0_17, %c0_18] : memref<8x128xf32, #tpu.memory_space<vmem>>, vector<8x128xf32>
    tpu.vector_store %arg8[%c0_17, %c0_18], %21 {strides = array<i32>} : memref<8x128xf32, #tpu.memory_space<vmem>>, vector<8x128xf32>,
    return
  }
  func.func @transform_0(%arg0: i32) -> (i32, i32) {
    %c0_i32 = arith.constant 0 : i32
    %c0_i32_0 = arith.constant 0 : i32
    return %arg0, %c0_i32 : i32, i32
  }
  func.func @transform_1(%arg0: i32) -> (i32, i32) {
    %c0_i32 = arith.constant 0 : i32
    %c0_i32_0 = arith.constant 0 : i32
    %c0_i32_1 = arith.constant 0 : i32
    return %c0_i32, %c0_i32_0 : i32, i32
  }
  func.func @transform_2(%arg0: i32) -> (i32, i32) {
    %c0_i32 = arith.constant 0 : i32
    %c0_i32_0 = arith.constant 0 : i32
    %c0_i32_1 = arith.constant 0 : i32
    return %c0_i32, %c0_i32_0 : i32, i32
  }
  func.func @transform_3(%arg0: i32) -> (i32, i32) {
    %c0_i32 = arith.constant 0 : i32
    %c0_i32_0 = arith.constant 0 : i32
    %c0_i32_1 = arith.constant 0 : i32
    return %c0_i32, %c0_i32_0 : i32, i32
  }
  func.func @transform_4(%arg0: i32) -> (i32, i32) {
    %c0_i32 = arith.constant 0 : i32
    %c0_i32_0 = arith.constant 0 : i32
    %c0_i32_1 = arith.constant 0 : i32
    return %c0_i32, %c0_i32_0 : i32, i32
  }
  func.func @transform_5(%arg0: i32) -> (i32, i32) {
    %c0_i32 = arith.constant 0 : i32
    %c0_i32_0 = arith.constant 0 : i32
    %c0_i32_1 = arith.constant 0 : i32
    return %c0_i32, %c0_i32_0 : i32, i32
  }
  func.func @transform_6(%arg0: i32) -> (i32, i32) {
    %c0_i32 = arith.constant 0 : i32
    %c0_i32_0 = arith.constant 0 : i32
    %c0_i32_1 = arith.constant 0 : i32
    return %c0_i32, %c0_i32_0 : i32, i32
  }
  func.func @transform_7(%arg0: i32) -> (i32, i32) {
    %c0_i32 = arith.constant 0 : i32
    %c0_i32_0 = arith.constant 0 : i32
    return %arg0, %c0_i32 : i32, i32
  }
}

module attributes {stable_mosaic.version = 11 : i64} {
  func.func @_convnet_kernel(%arg0: i32, %arg1: memref<1x40x128xbf16, #tpu.memory_space<vmem>>, %arg2: memref<640x256xbf16, #tpu.memory_space<vmem>>, %arg3: memref<1x256xf32, #tpu.memory_space<vmem>>, %arg4: memref<24x32xf32, #tpu.memory_space<vmem>>, %arg5: memref<256x128xf32, #tpu.memory_space<vmem>>, %arg6: memref<640x256xbf16, #tpu.memory_space<vmem>>, %arg7: memref<1x256xf32, #tpu.memory_space<vmem>>, %arg8: memref<8x16xf32, #tpu.memory_space<vmem>>, %arg9: memref<256x128xf32, #tpu.memory_space<vmem>>, %arg10: memref<1x8x128xbf16, #tpu.memory_space<vmem>>) attributes {dimension_semantics = [#tpu.dimension_semantics<parallel>], iteration_bounds = array<i64: 2>, scalar_prefetch = 0 : i64, scratch_operands = 0 : i64, tpu.core_type = #tpu.core_type<tc>, window_params = [{transform_indices = @transform_0, window_bounds = array<i64: 1, 40, 128>}, {pipeline_mode = #tpu.pipeline_mode<synchronous>, transform_indices = @transform_1, window_bounds = array<i64: 640, 256>}, {pipeline_mode = #tpu.pipeline_mode<synchronous>, transform_indices = @transform_2, window_bounds = array<i64: 1, 256>}, {pipeline_mode = #tpu.pipeline_mode<synchronous>, transform_indices = @transform_3, window_bounds = array<i64: 24, 32>}, {pipeline_mode = #tpu.pipeline_mode<synchronous>, transform_indices = @transform_4, window_bounds = array<i64: 256, 128>}, {pipeline_mode = #tpu.pipeline_mode<synchronous>, transform_indices = @transform_5, window_bounds = array<i64: 640, 256>}, {pipeline_mode = #tpu.pipeline_mode<synchronous>, transform_indices = @transform_6, window_bounds = array<i64: 1, 256>}, {pipeline_mode = #tpu.pipeline_mode<synchronous>, transform_indices = @transform_7, window_bounds = array<i64: 8, 16>}, {pipeline_mode = #tpu.pipeline_mode<synchronous>, transform_indices = @transform_8, window_bounds = array<i64: 256, 128>}, {transform_indices = @transform_9, window_bounds = array<i64: 1, 8, 128>}]} {
    %c0 = arith.constant 0 : index
    %c0_0 = arith.constant 0 : index
    %c0_1 = arith.constant 0 : index
    %0 = vector.load %arg1[%c0, %c0_0, %c0_1] : memref<1x40x128xbf16, #tpu.memory_space<vmem>>, vector<1x40x128xbf16>
    %1 = vector.extract_strided_slice %0 {offsets = [0, 0, 0], sizes = [1, 32, 128], strides = [1, 1, 1]} : vector<1x40x128xbf16> to vector<1x32x128xbf16>
    %2 = vector.shape_cast %1 : vector<1x32x128xbf16> to vector<32x128xbf16>
    %3 = vector.extract_strided_slice %0 {offsets = [0, 1, 0], sizes = [1, 32, 128], strides = [1, 1, 1]} : vector<1x40x128xbf16> to vector<1x32x128xbf16>
    %4 = vector.shape_cast %3 : vector<1x32x128xbf16> to vector<32x128xbf16>
    %5 = vector.extract_strided_slice %0 {offsets = [0, 2, 0], sizes = [1, 32, 128], strides = [1, 1, 1]} : vector<1x40x128xbf16> to vector<1x32x128xbf16>
    %6 = vector.shape_cast %5 : vector<1x32x128xbf16> to vector<32x128xbf16>
    %7 = vector.extract_strided_slice %0 {offsets = [0, 3, 0], sizes = [1, 32, 128], strides = [1, 1, 1]} : vector<1x40x128xbf16> to vector<1x32x128xbf16>
    %8 = vector.shape_cast %7 : vector<1x32x128xbf16> to vector<32x128xbf16>
    %9 = vector.extract_strided_slice %0 {offsets = [0, 4, 0], sizes = [1, 32, 128], strides = [1, 1, 1]} : vector<1x40x128xbf16> to vector<1x32x128xbf16>
    %10 = vector.shape_cast %9 : vector<1x32x128xbf16> to vector<32x128xbf16>
    %11 = tpu.concatenate %2, %4, %6, %8, %10 in 1 : vector<32x128xbf16>, vector<32x128xbf16>, vector<32x128xbf16>, vector<32x128xbf16>, vector<32x128xbf16> -> vector<32x640xbf16>
    %c0_2 = arith.constant 0 : index
    %c0_3 = arith.constant 0 : index
    %12 = vector.load %arg2[%c0_2, %c0_3] : memref<640x256xbf16, #tpu.memory_space<vmem>>, vector<640x256xbf16>
    %cst = arith.constant dense<0.000000e+00> : vector<32x256xf32>
    %13 = tpu.matmul %11, %12, %cst {dimension_numbers = #tpu.dot_dimension_numbers<[1], [0], [0], [1], [0, 0, 1, 1], [], []>} : vector<32x640xbf16>, vector<640x256xbf16>, vector<32x256xf32> -> vector<32x256xf32>
    %c0_4 = arith.constant 0 : index
    %c0_5 = arith.constant 0 : index
    %14 = vector.load %arg3[%c0_4, %c0_5] : memref<1x256xf32, #tpu.memory_space<vmem>>, vector<1x256xf32>
    %15 = vector.broadcast %14 : vector<1x256xf32> to vector<32x256xf32>
    %16 = arith.addf %13, %15 : vector<32x256xf32>
    %c0_6 = arith.constant 0 : index
    %c0_7 = arith.constant 0 : index
    %17 = vector.load %arg4[%c0_6, %c0_7] : memref<24x32xf32, #tpu.memory_space<vmem>>, vector<24x32xf32>
    %cst_8 = arith.constant dense<0.000000e+00> : vector<24x256xf32>
    %18 = tpu.matmul %17, %16, %cst_8 {dimension_numbers = #tpu.dot_dimension_numbers<[1], [0], [0], [1], [0, 0, 1, 1], [], []>} : vector<24x32xf32>, vector<32x256xf32>, vector<24x256xf32> -> vector<24x256xf32>
    %c0_9 = arith.constant 0 : index
    %c0_10 = arith.constant 0 : index
    %19 = vector.load %arg5[%c0_9, %c0_10] : memref<256x128xf32, #tpu.memory_space<vmem>>, vector<256x128xf32>
    %cst_11 = arith.constant dense<0.000000e+00> : vector<24x128xf32>
    %20 = tpu.matmul %18, %19, %cst_11 {dimension_numbers = #tpu.dot_dimension_numbers<[1], [0], [0], [1], [0, 0, 1, 1], [], []>} : vector<24x256xf32>, vector<256x128xf32>, vector<24x128xf32> -> vector<24x128xf32>
    %21 = arith.truncf %20 : vector<24x128xf32> to vector<24x128xbf16>
    %22 = vector.extract_strided_slice %21 {offsets = [0, 0], sizes = [16, 128], strides = [1, 1]} : vector<24x128xbf16> to vector<16x128xbf16>
    %23 = vector.extract_strided_slice %21 {offsets = [1, 0], sizes = [16, 128], strides = [1, 1]} : vector<24x128xbf16> to vector<16x128xbf16>
    %24 = vector.extract_strided_slice %21 {offsets = [2, 0], sizes = [16, 128], strides = [1, 1]} : vector<24x128xbf16> to vector<16x128xbf16>
    %25 = vector.extract_strided_slice %21 {offsets = [3, 0], sizes = [16, 128], strides = [1, 1]} : vector<24x128xbf16> to vector<16x128xbf16>
    %26 = vector.extract_strided_slice %21 {offsets = [4, 0], sizes = [16, 128], strides = [1, 1]} : vector<24x128xbf16> to vector<16x128xbf16>
    %27 = tpu.concatenate %22, %23, %24, %25, %26 in 1 : vector<16x128xbf16>, vector<16x128xbf16>, vector<16x128xbf16>, vector<16x128xbf16>, vector<16x128xbf16> -> vector<16x640xbf16>
    %c0_12 = arith.constant 0 : index
    %c0_13 = arith.constant 0 : index
    %28 = vector.load %arg6[%c0_12, %c0_13] : memref<640x256xbf16, #tpu.memory_space<vmem>>, vector<640x256xbf16>
    %cst_14 = arith.constant dense<0.000000e+00> : vector<16x256xf32>
    %29 = tpu.matmul %27, %28, %cst_14 {dimension_numbers = #tpu.dot_dimension_numbers<[1], [0], [0], [1], [0, 0, 1, 1], [], []>} : vector<16x640xbf16>, vector<640x256xbf16>, vector<16x256xf32> -> vector<16x256xf32>
    %c0_15 = arith.constant 0 : index
    %c0_16 = arith.constant 0 : index
    %30 = vector.load %arg7[%c0_15, %c0_16] : memref<1x256xf32, #tpu.memory_space<vmem>>, vector<1x256xf32>
    %31 = vector.broadcast %30 : vector<1x256xf32> to vector<16x256xf32>
    %32 = arith.addf %29, %31 : vector<16x256xf32>
    %c0_17 = arith.constant 0 : index
    %c0_18 = arith.constant 0 : index
    %33 = vector.load %arg8[%c0_17, %c0_18] : memref<8x16xf32, #tpu.memory_space<vmem>>, vector<8x16xf32>
    %cst_19 = arith.constant dense<0.000000e+00> : vector<8x256xf32>
    %34 = tpu.matmul %33, %32, %cst_19 {dimension_numbers = #tpu.dot_dimension_numbers<[1], [0], [0], [1], [0, 0, 1, 1], [], []>} : vector<8x16xf32>, vector<16x256xf32>, vector<8x256xf32> -> vector<8x256xf32>
    %c0_20 = arith.constant 0 : index
    %c0_21 = arith.constant 0 : index
    %35 = vector.load %arg9[%c0_20, %c0_21] : memref<256x128xf32, #tpu.memory_space<vmem>>, vector<256x128xf32>
    %cst_22 = arith.constant dense<0.000000e+00> : vector<8x128xf32>
    %36 = tpu.matmul %34, %35, %cst_22 {dimension_numbers = #tpu.dot_dimension_numbers<[1], [0], [0], [1], [0, 0, 1, 1], [], []>} : vector<8x256xf32>, vector<256x128xf32>, vector<8x128xf32> -> vector<8x128xf32>
    %37 = vector.shape_cast %36 : vector<8x128xf32> to vector<1x8x128xf32>
    %38 = arith.truncf %37 : vector<1x8x128xf32> to vector<1x8x128xbf16>
    %c0_23 = arith.constant 0 : index
    %c0_24 = arith.constant 0 : index
    %c0_25 = arith.constant 0 : index
    %39 = vector.load %arg10[%c0_23, %c0_24, %c0_25] : memref<1x8x128xbf16, #tpu.memory_space<vmem>>, vector<1x8x128xbf16>
    tpu.vector_store %arg10[%c0_23, %c0_24, %c0_25], %38 {strides = array<i32>} : memref<1x8x128xbf16, #tpu.memory_space<vmem>>, vector<1x8x128xbf16>,
    return
  }
  func.func @transform_0(%arg0: i32) -> (i32, i32, i32) {
    %c0_i32 = arith.constant 0 : i32
    %c0_i32_0 = arith.constant 0 : i32
    %c0_i32_1 = arith.constant 0 : i32
    return %arg0, %c0_i32, %c0_i32_0 : i32, i32, i32
  }
  func.func @transform_1(%arg0: i32) -> (i32, i32) {
    %c0_i32 = arith.constant 0 : i32
    %c0_i32_0 = arith.constant 0 : i32
    %c0_i32_1 = arith.constant 0 : i32
    return %c0_i32, %c0_i32_0 : i32, i32
  }
  func.func @transform_2(%arg0: i32) -> (i32, i32) {
    %c0_i32 = arith.constant 0 : i32
    %c0_i32_0 = arith.constant 0 : i32
    %c0_i32_1 = arith.constant 0 : i32
    return %c0_i32, %c0_i32_0 : i32, i32
  }
  func.func @transform_3(%arg0: i32) -> (i32, i32) {
    %c0_i32 = arith.constant 0 : i32
    %c0_i32_0 = arith.constant 0 : i32
    %c0_i32_1 = arith.constant 0 : i32
    return %c0_i32, %c0_i32_0 : i32, i32
  }
  func.func @transform_4(%arg0: i32) -> (i32, i32) {
    %c0_i32 = arith.constant 0 : i32
    %c0_i32_0 = arith.constant 0 : i32
    %c0_i32_1 = arith.constant 0 : i32
    return %c0_i32, %c0_i32_0 : i32, i32
  }
  func.func @transform_5(%arg0: i32) -> (i32, i32) {
    %c0_i32 = arith.constant 0 : i32
    %c0_i32_0 = arith.constant 0 : i32
    %c0_i32_1 = arith.constant 0 : i32
    return %c0_i32, %c0_i32_0 : i32, i32
  }
  func.func @transform_6(%arg0: i32) -> (i32, i32) {
    %c0_i32 = arith.constant 0 : i32
    %c0_i32_0 = arith.constant 0 : i32
    %c0_i32_1 = arith.constant 0 : i32
    return %c0_i32, %c0_i32_0 : i32, i32
  }
  func.func @transform_7(%arg0: i32) -> (i32, i32) {
    %c0_i32 = arith.constant 0 : i32
    %c0_i32_0 = arith.constant 0 : i32
    %c0_i32_1 = arith.constant 0 : i32
    return %c0_i32, %c0_i32_0 : i32, i32
  }
  func.func @transform_8(%arg0: i32) -> (i32, i32) {
    %c0_i32 = arith.constant 0 : i32
    %c0_i32_0 = arith.constant 0 : i32
    %c0_i32_1 = arith.constant 0 : i32
    return %c0_i32, %c0_i32_0 : i32, i32
  }
  func.func @transform_9(%arg0: i32) -> (i32, i32, i32) {
    %c0_i32 = arith.constant 0 : i32
    %c0_i32_0 = arith.constant 0 : i32
    %c0_i32_1 = arith.constant 0 : i32
    return %arg0, %c0_i32, %c0_i32_0 : i32, i32, i32
  }
}

</mosaic_0001>

<bundles_post_ra>
// kernel: lenet5_forward.3
= control target key start
LH: loop header
LB: loop body
LE: loop exit
PB: predicated region body
PF: predicated region fallthrough
CT: control target
= control target key end

     0   :  { %12 = vsyncpa [#allocation3], 0  ;;  %s1440_s0 = inlined_call_operand.vmem [shape: bf16[8,1024], index: 0, kind: input, shape index: {}]   ;;  %s1441_s1 = inlined_call_operand.hbm [shape: bf16[1024,128], index: 1, kind: input, shape index: {}]   ;;  %s1442_s2 = inlined_call_operand.vmem [shape: f32[1,128], index: 2, kind: input, shape index: {}]   ;;  %s1443_s3 = inlined_call_operand.vmem [shape: bf16[128,128], index: 3, kind: input, shape index: {}]   ;;  %s1444_s4 = inlined_call_operand.vmem [shape: f32[1,128], index: 4, kind: input, shape index: {}]   ;;  %s1445_s5 = inlined_call_operand.hbm [shape: bf16[128,128], index: 5, kind: input, shape index: {}]   ;;  %s1446_s6 = inlined_call_operand.vmem [shape: f32[1,128], index: 6, kind: input, shape index: {}]   ;;  %s1447_s7 = inlined_call_operand.vmem [shape: f32[8,128], index: 7, kind: output, shape index: {}]  }
   0x1   :  { %s20_s26 = sshll.u32 %s1441_s1, 4  ;;  %s21_s26 = int_to_ptr.hbm [resolvable:$true] %s20_s26 }
   0x2   :  { %13 = vsyncpa [#allocation5], 0  ;;  %s1342_s27 = smov [#allocation2]   ;;  %s39_s8 = sshll.u32 %s1445_s5, 4  ;;  %s40_s8 = int_to_ptr.hbm [resolvable:$true] %s39_s8 }
   0x3   :  { %s22_s28 = sshll.u32 %s1342_s27, 4  ;;  %s1343_s9 = smov 64   ;;  %s23_s28 = int_to_ptr.vmem [resolvable:$true] %s22_s28 }
   0x4   :  { %s1344_s10 = smov 4   ;;  %s1345_s11 = smov [#allocation4]  }
   0x5   :  { %28 = dma.hbm_to_vmem [thread:$0]  %s21_s26, 8192, %s23_s28, [#allocation3], %s1343_s9, %s1343_s9, %s1344_s10  }
   0x6   :  { %s41_s12 = sshll.u32 %s1345_s11, 4  ;;  %s42_s12 = int_to_ptr.vmem [resolvable:$true] %s41_s12 }
   0x7   :  { %47 = dma.hbm_to_vmem [thread:$0]  %s40_s8, 1024, %s42_s12, [#allocation5], %s1343_s9, %s1343_s9, %s1344_s10  }
   0x8   :  { %1338 = dma.done.wait [#allocation3], 8192  }
   0x9   :  { %1339 = vsyncadd [#allocation3], 4294959104 }
   0xa   :  { %1340 = dma.done.wait [#allocation5], 1024  }
   0xb   :  { %1341 = vsyncadd [#allocation5], 4294966272  ;;  %v1210_v0 = vld [vmem:[#allocation2 + $0x38] sm:$0xff]  ;;  %v1209_v4 = vld [vmem:[#allocation2 + $0x30] sm:$0xff] }
   0xc   :  { %v1218_v1 = vld [vmem:[#allocation2 + $0x78] sm:$0xff]  ;;  %606 = vmatpush.bf16.msra.mxu0 %v1210_v0  ;;  %v1217_v5 = vld [vmem:[#allocation2 + $0x70] sm:$0xff]  ;;  %v1208_v8 = vld [vmem:[#allocation2 + $0x28] sm:$0xff] }
   0xd   :  { %v1226_v2 = vld [vmem:[#allocation2 + $0xb8] sm:$0xff]  ;;  %619 = vmatpush.bf16.msra.mxu1 %v1218_v1  ;;  %v1225_v6 = vld [vmem:[#allocation2 + $0xb0] sm:$0xff]  ;;  %v1216_v9 = vld [vmem:[#allocation2 + $0x68] sm:$0xff] }
   0xe   :  { %v1234_v3 = vld [vmem:[#allocation2 + $0xf8] sm:$0xff]  ;;  %632 = vmatpush.bf16.msra.mxu2 %v1226_v2  ;;  %v1233_v7 = vld [vmem:[#allocation2 + $0xf0] sm:$0xff]  ;;  %v1224_v10 = vld [vmem:[#allocation2 + $0xa8] sm:$0xff] }
   0xf   :  { %645 = vmatpush.bf16.msra.mxu3 %v1234_v3  ;;  %v1232_v11 = vld [vmem:[#allocation2 + $0xe8] sm:$0xff]  ;;  %v1207_v12 = vld [vmem:[#allocation2 + $0x20] sm:$0xff]  ;;  %v1206_v16 = vld [vmem:[#allocation2 + $0x18] sm:$0xff] }
  0x10   :  { %607 = vmatpush.bf16.msra.mxu0 %v1209_v4  ;;  %v1215_v13 = vld [vmem:[#allocation2 + $0x60] sm:$0xff]  ;;  %v1214_v17 = vld [vmem:[#allocation2 + $0x58] sm:$0xff]  ;;  %v1205_v20 = vld [vmem:[#allocation2 + $0x10] sm:$0xff] }
  0x11   :  { %620 = vmatpush.bf16.msra.mxu1 %v1217_v5  ;;  %v1223_v14 = vld [vmem:[#allocation2 + $0xa0] sm:$0xff]  ;;  %v1222_v18 = vld [vmem:[#allocation2 + $0x98] sm:$0xff]  ;;  %v1213_v21 = vld [vmem:[#allocation2 + $0x50] sm:$0xff] }
  0x12   :  { %633 = vmatpush.bf16.msra.mxu2 %v1225_v6  ;;  %v1231_v15 = vld [vmem:[#allocation2 + $0xe0] sm:$0xff]  ;;  %v1230_v19 = vld [vmem:[#allocation2 + $0xd8] sm:$0xff]  ;;  %v1221_v22 = vld [vmem:[#allocation2 + $0x90] sm:$0xff] }
  0x13   :  { %646 = vmatpush.bf16.msra.mxu3 %v1233_v7  ;;  %v1229_v23 = vld [vmem:[#allocation2 + $0xd0] sm:$0xff]  ;;  %v1204_v24 = vld [vmem:[#allocation2 + $0x8] sm:$0xff]  ;;  %v58_v29 = vld [vmem:[%s1440_s0] sm:$0xff] }
  0x14   :  { %608 = vmatpush.bf16.msra.mxu0 %v1208_v8  ;;  %v1212_v25 = vld [vmem:[#allocation2 + $0x48] sm:$0xff]  ;;  %v1203_v30 = vld [vmem:[#allocation2] sm:$0xff]  ;;  %v198_v33 = vunpack.c.l.b16 %v58_v29  ;;  %v199_v37 = vunpack.c.h.b16 %v58_v29  ;;  %v1242_v38 = vld [vmem:[#allocation2 + $0x138] sm:$0xff] }
  0x15   :  { %621 = vmatpush.bf16.msra.mxu1 %v1216_v9  ;;  %v1220_v26 = vld [vmem:[#allocation2 + $0x88] sm:$0xff]  ;;  %v1211_v31 = vld [vmem:[#allocation2 + $0x40] sm:$0xff]  ;;  %v1250_v39 = vld [vmem:[#allocation2 + $0x178] sm:$0xff] }
  0x16   :  { %634 = vmatpush.bf16.msra.mxu2 %v1224_v10  ;;  %v1228_v27 = vld [vmem:[#allocation2 + $0xc8] sm:$0xff]  ;;  %v1219_v34 = vld [vmem:[#allocation2 + $0x80] sm:$0xff]  ;;  %v1258_v40 = vld [vmem:[#allocation2 + $0x1b8] sm:$0xff]  ;;  %v206_v43 = vpack.c.b16 %v198_v33, %v198_v33  ;;  %v207_v45 = vpack.c.b16 %v199_v37, %v199_v37 }
  0x17   :  { %647 = vmatpush.bf16.msra.mxu3 %v1232_v11  ;;  %v59_v28 = vld [vmem:[%s1440_s0 + $0x8] sm:$0xff]  ;;  %v1227_v35 = vld [vmem:[#allocation2 + $0xc0] sm:$0xff]  ;;  %v1266_v41 = vld [vmem:[#allocation2 + $0x1f8] sm:$0xff] }
  0x18   :  { %609 = vmatpush.bf16.msra.mxu0 %v1207_v12  ;;  %v200_v32 = vunpack.c.l.b16 %v59_v28  ;;  %v201_v36 = vunpack.c.h.b16 %v59_v28  ;;  %v1241_v46 = vld [vmem:[#allocation2 + $0x130] sm:$0xff]  ;;  %v1240_v50 = vld [vmem:[#allocation2 + $0x128] sm:$0xff]  ;;  %v1239_v54 = vld [vmem:[#allocation2 + $0x120] sm:$0xff] }
  0x19   :  { %622 = vmatpush.bf16.msra.mxu1 %v1215_v13  ;;  %v1249_v47 = vld [vmem:[#allocation2 + $0x170] sm:$0xff]  ;;  %v1248_v51 = vld [vmem:[#allocation2 + $0x168] sm:$0xff]  ;;  %v1247_v55 = vld [vmem:[#allocation2 + $0x160] sm:$0xff] }
  0x1a   :  { %635 = vmatpush.bf16.msra.mxu2 %v1223_v14  ;;  %v208_v42 = vpack.c.b16 %v200_v32, %v200_v32  ;;  %v209_v44 = vpack.c.b16 %v201_v36, %v201_v36  ;;  %v1257_v48 = vld [vmem:[#allocation2 + $0x1b0] sm:$0xff]  ;;  %v1256_v52 = vld [vmem:[#allocation2 + $0x1a8] sm:$0xff]  ;;  %v1255_v56 = vld [vmem:[#allocation2 + $0x1a0] sm:$0xff] }
  0x1b   :  { %648 = vmatpush.bf16.msra.mxu3 %v1231_v15  ;;  %v1265_v49 = vld [vmem:[#allocation2 + $0x1f0] sm:$0xff]  ;;  %v1264_v53 = vld [vmem:[#allocation2 + $0x1e8] sm:$0xff]  ;;  %v1263_v57 = vld [vmem:[#allocation2 + $0x1e0] sm:$0xff] }
  0x1c   :  { %610 = vmatpush.bf16.msra.mxu0 %v1206_v16  ;;  %v1238_v58 = vld [vmem:[#allocation2 + $0x118] sm:$0xff]  ;;  %v1237_v62 = vld [vmem:[#allocation2 + $0x110] sm:$0xff]  ;;  %v1236_v2 = vld [vmem:[#allocation2 + $0x108] sm:$0xff] }
  0x1d   :  { %623 = vmatpush.bf16.msra.mxu1 %v1214_v17  ;;  %v1246_v59 = vld [vmem:[#allocation2 + $0x158] sm:$0xff]  ;;  %v1245_v63 = vld [vmem:[#allocation2 + $0x150] sm:$0xff]  ;;  %v1244_v3 = vld [vmem:[#allocation2 + $0x148] sm:$0xff] }
  0x1e   :  { %636 = vmatpush.bf16.msra.mxu2 %v1222_v18  ;;  %v1254_v60 = vld [vmem:[#allocation2 + $0x198] sm:$0xff]  ;;  %v1253_v0 = vld [vmem:[#allocation2 + $0x190] sm:$0xff]  ;;  %v1252_v5 = vld [vmem:[#allocation2 + $0x188] sm:$0xff] }
  0x1f   :  { %649 = vmatpush.bf16.msra.mxu3 %v1230_v19  ;;  %v1262_v61 = vld [vmem:[#allocation2 + $0x1d8] sm:$0xff]  ;;  %v1261_v1 = vld [vmem:[#allocation2 + $0x1d0] sm:$0xff]  ;;  %v1260_v6 = vld [vmem:[#allocation2 + $0x1c8] sm:$0xff] }
  0x20   :  { %611 = vmatpush.bf16.msra.mxu0 %v1205_v20  ;;  %v60_v4 = vld [vmem:[%s1440_s0 + $0x10] sm:$0xff]  ;;  %v61_v7 = vld [vmem:[%s1440_s0 + $0x18] sm:$0xff]  ;;  %v1235_v10 = vld [vmem:[#allocation2 + $0x100] sm:$0xff] }
  0x21   :  { %624 = vmatpush.bf16.msra.mxu1 %v1213_v21  ;;  %v202_v8 = vunpack.c.l.b16 %v60_v4  ;;  %v203_v9 = vunpack.c.h.b16 %v60_v4  ;;  %v1243_v11 = vld [vmem:[#allocation2 + $0x140] sm:$0xff]  ;;  %v204_v12 = vunpack.c.l.b16 %v61_v7  ;;  %v205_v13 = vunpack.c.h.b16 %v61_v7  ;;  %v1274_v20 = vld [vmem:[%s1443_s3 + $0x38] sm:$0xff]  ;;  %v1273_v21 = vld [vmem:[%s1443_s3 + $0x30] sm:$0xff] }
  0x22   :  { %637 = vmatpush.bf16.msra.mxu2 %v1221_v22  ;;  %v1251_v14 = vld [vmem:[#allocation2 + $0x180] sm:$0xff]  ;;  %v1272_v22 = vld [vmem:[%s1443_s3 + $0x28] sm:$0xff] }
  0x23   :  { %650 = vmatpush.bf16.msra.mxu3 %v1229_v23  ;;  %v1259_v15 = vld [vmem:[#allocation2 + $0x1c0] sm:$0xff]  ;;  %v210_v16 = vpack.c.b16 %v202_v8, %v202_v8  ;;  %v211_v17 = vpack.c.b16 %v203_v9, %v203_v9  ;;  %v212_v18 = vpack.c.b16 %v204_v12, %v204_v12  ;;  %v213_v19 = vpack.c.b16 %v205_v13, %v205_v13  ;;  %v1268_v28 = vld [vmem:[%s1443_s3 + $0x8] sm:$0xff] }
  0x24   :  { %612 = vmatpush.bf16.msra.mxu0 %v1204_v24  ;;  %v1271_v23 = vld [vmem:[%s1443_s3 + $0x20] sm:$0xff]  ;;  %v1270_v24 = vld [vmem:[%s1443_s3 + $0x18] sm:$0xff] }
  0x25   :  { %625 = vmatpush.bf16.msra.mxu1 %v1212_v25  ;;  %v1267_v32 = vld [vmem:[%s1443_s3] sm:$0xff] }
  0x26   :  { %638 = vmatpush.bf16.msra.mxu2 %v1220_v26  ;;  %v1269_v26 = vld [vmem:[%s1443_s3 + $0x10] sm:$0xff] }
  0x27   :  { %651 = vmatpush.bf16.msra.mxu3 %v1228_v27 }
  0x28   :  { %613 = vmatpush.bf16.msra.mxu0 %v1203_v30 }
  0x29   :  { %626 = vmatpush.bf16.msra.mxu1 %v1211_v31 }
  0x2a   :  { %639 = vmatpush.bf16.msra.mxu2 %v1219_v34  ;;  %v1287_v34 = vld [vmem:[%s1442_s2] ss:$0 sm:$0xff] }
  0x2b   :  { %652 = vmatpush.bf16.msra.mxu3 %v1227_v35  ;;  %614 = vmatmul.bf16.vlgmr.msra.gmra.mxu0 %v206_v43  ;;  %v1282_v35 = vld [vmem:[#allocation4 + $0x38] sm:$0xff] }
  0x2c   :  { %658 = vmatpush.bf16.msrb.mxu0 %v1242_v38  ;;  %627 = vmatmul.bf16.vlgmr.msra.gmra.mxu1 %v207_v45  ;;  %v1281_v38 = vld [vmem:[#allocation4 + $0x30] sm:$0xff] }
  0x2d   :  { %671 = vmatpush.bf16.msrb.mxu1 %v1250_v39  ;;  %640 = vmatmul.bf16.vlgmr.msra.gmra.mxu2 %v208_v42  ;;  %v1279_v42 = vld [vmem:[#allocation4 + $0x20] sm:$0xff] }
  0x2e   :  { %684 = vmatpush.bf16.msrb.mxu2 %v1258_v40  ;;  %653 = vmatmul.bf16.vlgmr.msra.gmra.mxu3 %v209_v44  ;;  %v1280_v40 = vld [vmem:[#allocation4 + $0x28] sm:$0xff]  ;;  %v1278_v44 = vld [vmem:[#allocation4 + $0x18] sm:$0xff] }
  0x2f   :  { %697 = vmatpush.bf16.msrb.mxu3 %v1266_v41 }
  0x30   :  { %659 = vmatpush.bf16.msrb.mxu0 %v1241_v46 }
  0x31   :  { %672 = vmatpush.bf16.msrb.mxu1 %v1249_v47 }
  0x32   :  { %685 = vmatpush.bf16.msrb.mxu2 %v1257_v48 }
  0x33   :  { %698 = vmatpush.bf16.msrb.mxu3 %v1265_v49  ;;  %v1277_v49 = vld [vmem:[#allocation4 + $0x10] sm:$0xff] }
  0x34   :  { %660 = vmatpush.bf16.msrb.mxu0 %v1240_v50 }
  0x35   :  { %673 = vmatpush.bf16.msrb.mxu1 %v1248_v51 }
  0x36   :  { %686 = vmatpush.bf16.msrb.mxu2 %v1256_v52 }
  0x37   :  { %699 = vmatpush.bf16.msrb.mxu3 %v1264_v53 }
  0x38   :  { %661 = vmatpush.bf16.msrb.mxu0 %v1239_v54 }
  0x39   :  { %674 = vmatpush.bf16.msrb.mxu1 %v1247_v55 }
  0x3a   :  { %687 = vmatpush.bf16.msrb.mxu2 %v1255_v56 }
  0x3b   :  { %700 = vmatpush.bf16.msrb.mxu3 %v1263_v57 }
  0x3c   :  { %662 = vmatpush.bf16.msrb.mxu0 %v1238_v58 }
  0x3d   :  { %675 = vmatpush.bf16.msrb.mxu1 %v1246_v59 }
  0x3e   :  { %688 = vmatpush.bf16.msrb.mxu2 %v1254_v60 }
  0x3f   :  { %701 = vmatpush.bf16.msrb.mxu3 %v1262_v61  ;;  %v1276_v61 = vld [vmem:[#allocation4 + $0x8] sm:$0xff] }
  0x40   :  { %663 = vmatpush.bf16.msrb.mxu0 %v1237_v62  ;;  %v1275_v62 = vld [vmem:[#allocation4] sm:$0xff] }
  0x41   :  { %676 = vmatpush.bf16.msrb.mxu1 %v1245_v63  ;;  %v1288_v63 = vld [vmem:[%s1444_s4] ss:$0 sm:$0xff] }
  0x42   :  { %689 = vmatpush.bf16.msrb.mxu2 %v1253_v0 }
  0x43   :  { %702 = vmatpush.bf16.msrb.mxu3 %v1261_v1 }
  0x44   :  { %664 = vmatpush.bf16.msrb.mxu0 %v1236_v2 }
  0x45   :  { %677 = vmatpush.bf16.msrb.mxu1 %v1244_v3 }
  0x46   :  { %690 = vmatpush.bf16.msrb.mxu2 %v1252_v5  ;;  %v1289_v5 = vld [vmem:[%s1446_s6] ss:$0 sm:$0xff] }
  0x47   :  { %703 = vmatpush.bf16.msrb.mxu3 %v1260_v6 }
  0x48   :  { %665 = vmatpush.bf16.msrb.mxu0 %v1235_v10 }
  0x49   :  { %678 = vmatpush.bf16.msrb.mxu1 %v1243_v11 }
  0x4a   :  { %691 = vmatpush.bf16.msrb.mxu2 %v1251_v14 }
  0x4b   :  { %704 = vmatpush.bf16.msrb.mxu3 %v1259_v15  ;;  %666 = vmatmul.bf16.vlgmr.msrb.gmra.mxu0 %v210_v16 }
  0x4c   :  { %679 = vmatmul.bf16.vlgmr.msrb.gmra.mxu1 %v211_v17  ;;  %780 = vmatpush.bf16.msra.mxu0 %v1274_v20 }
  0x4d   :  { %692 = vmatmul.bf16.vlgmr.msrb.gmra.mxu2 %v212_v18  ;;  %863 = vmatpush.bf16.msra.mxu1 %v1282_v35 }
  0x4e   :  { %705 = vmatmul.bf16.vlgmr.msrb.gmra.mxu3 %v213_v19 }
  0x50   :  { %781 = vmatpush.bf16.msra.mxu0 %v1273_v21 }
  0x51   :  { %864 = vmatpush.bf16.msra.mxu1 %v1281_v38 }
  0x54   :  { %782 = vmatpush.bf16.msra.mxu0 %v1272_v22 }
  0x55   :  { %865 = vmatpush.bf16.msra.mxu1 %v1280_v40 }
  0x58   :  { %783 = vmatpush.bf16.msra.mxu0 %v1271_v23 }
  0x59   :  { %866 = vmatpush.bf16.msra.mxu1 %v1279_v42 }
  0x5c   :  { %784 = vmatpush.bf16.msra.mxu0 %v1270_v24 }
  0x5d   :  { %867 = vmatpush.bf16.msra.mxu1 %v1278_v44 }
  0x60   :  { %785 = vmatpush.bf16.msra.mxu0 %v1269_v26 }
  0x61   :  { %868 = vmatpush.bf16.msra.mxu1 %v1277_v49 }
  0x64   :  { %786 = vmatpush.bf16.msra.mxu0 %v1268_v28 }
  0x65   :  { %869 = vmatpush.bf16.msra.mxu1 %v1276_v61 }
  0x68   :  { %787 = vmatpush.bf16.msra.mxu0 %v1267_v32 }
  0x69   :  { %870 = vmatpush.bf16.msra.mxu1 %v1275_v62 }
  0xa8   :  { %v615_v25 = vpop.f32.mrf.mxu0 }
  0xa9   :  { %v628_v27 = vpop.f32.mrf.mxu1  ;;  %v616_v39 = vadd.f32 %v1287_v34, %v615_v25 }
  0xab   :  { %v629_v41 = vadd.f32 %v628_v27, %v616_v39 }
  0xb0   :  { %v641_v29 = vpop.f32.mrf.mxu2  ;;  %v617_v31 = vpop.f32.mrf.mxu0 }
  0xb1   :  { %v654_v30 = vpop.f32.mrf.mxu3  ;;  %v630_v33 = vpop.f32.mrf.mxu1  ;;  %v642_v43 = vadd.f32 %v641_v29, %v629_v41 }
  0xb3   :  { %v655_v45 = vadd.f32 %v654_v30, %v642_v43 }
  0xb8   :  { %v643_v36 = vpop.f32.mrf.mxu2 }
  0xb9   :  { %v656_v37 = vpop.f32.mrf.mxu3 }
  0xc8   :  { %v667_v46 = vpop.f32.mrf.mxu0 }
  0xc9   :  { %v680_v47 = vpop.f32.mrf.mxu1  ;;  %v668_v48 = vadd.f32 %v667_v46, %v655_v45 }
  0xcb   :  { %v681_v50 = vadd.f32 %v680_v47, %v668_v48 }
  0xd0   :  { %v693_v51 = vpop.f32.mrf.mxu2  ;;  %v669_v54 = vpop.f32.mrf.mxu0 }
  0xd1   :  { %v706_v52 = vpop.f32.mrf.mxu3  ;;  %v694_v53 = vadd.f32 %v693_v51, %v681_v50  ;;  %v682_v55 = vpop.f32.mrf.mxu1 }
  0xd3   :  { %v707_v56 = vadd.f32 %v706_v52, %v694_v53 }
  0xd5   :  { %v710_v57 = vmax.f32 %v707_v56, 0.0 }
  0xd7   :  { %v711_v58 = vpack.c.bf16 %v710_v57, %v710_v57 }
  0xd8   :  { %v695_v59 = vpop.f32.mrf.mxu2 }
  0xd9   :  { %v708_v60 = vpop.f32.mrf.mxu3  ;;  %788 = vmatmul.bf16.vlgmr.msra.gmra.mxu0 %v711_v58 }
 0x156   :  { %v789_v0 = vpop.f32.mrf.mxu0 }
 0x157   :  { %v790_v1 = vadd.f32 %v1288_v63, %v789_v0 }
 0x159   :  { %v793_v2 = vmax.f32 %v790_v1, 0.0 }
 0x15b   :  { %v794_v3 = vpack.c.bf16 %v793_v2, %v793_v2 }
 0x15d   :  { %871 = vmatmul.bf16.vlgmr.msra.gmra.mxu1 %v794_v3 }
 0x15e   :  { %v791_v4 = vpop.f32.mrf.mxu0 }
 0x1da   :  { %v872_v6 = vpop.f32.mrf.mxu1 }
 0x1db   :  { %v873_v7 = vadd.f32 %v1289_v5, %v872_v6 }
 0x1dd   :  { %876 = vst [vmem:[%s1447_s7] sm:$0xff] %v873_v7 }
 0x1e2   :  { %v874_v8 = vpop.f32.mrf.mxu1 }
 0x1e3   :  { %881 = vsyncpa [#allocation3], 1 }
 0x1e4   :  { %882 = vsyncpa [#allocation5], 1 }

// kernel: lenet5_forward.2
= control target key start
LH: loop header
LB: loop body
LE: loop exit
PB: predicated region body
PF: predicated region fallthrough
CT: control target
= control target key end

     0   :  { %14 = vsyncpa [#allocation3], 0  ;;  %s3870_s0 = inlined_call_operand.vmem [shape: bf16[2,40,128], index: 0, kind: input, shape index: {}]   ;;  %s3871_s1 = inlined_call_operand.vmem [shape: bf16[640,256], index: 1, kind: input, shape index: {}]   ;;  %s3872_s2 = inlined_call_operand.vmem [shape: f32[1,256], index: 2, kind: input, shape index: {}]   ;;  %s3873_s3 = inlined_call_operand.vmem [shape: f32[24,32], index: 3, kind: input, shape index: {}]   ;;  %s3874_s4 = inlined_call_operand.hbm [shape: f32[256,128], index: 4, kind: input, shape index: {}]   ;;  %s3875_s5 = inlined_call_operand.hbm [shape: bf16[640,256], index: 5, kind: input, shape index: {}]   ;;  %s3876_s6 = inlined_call_operand.vmem [shape: f32[1,256], index: 6, kind: input, shape index: {}]   ;;  %s3877_s7 = inlined_call_operand.vmem [shape: f32[8,16], index: 7, kind: input, shape index: {}]   ;;  %s3878_s8 = inlined_call_operand.hbm [shape: f32[256,128], index: 8, kind: input, shape index: {}]   ;;  %s3879_s9 = inlined_call_operand.vmem [shape: bf16[2,8,128], index: 9, kind: output, shape index: {}]  }
   0x1   :  { %15 = vsyncpa [#allocation5], 0  ;;  %s3189_s30 = smov 0  }
   0x2 LB: > { %s3195_s10 = sadd.s32 4294967295, %s3132_s30   ;;  %p2155_p0 = scmp.ge.s32.totalorder %s3132_s30, 1  ;;  %s3132_s30 = sphi %s3189_s30, %s21_s30  }
   0x3   : > { %p246_p1 = scmp.lt.s32.totalorder %s3132_s30, 3  ;;  %p3009_p2 = scmp.eq.s32.totalorder %s3195_s10, 0 }
   0x4   : > { %s280_s13 = sshll.u32 %s3875_s5, 4  ;;  %s266_s17 = sshll.u32 %s3874_s4, 4  ;;  %s281_s13 = int_to_ptr.hbm [resolvable:$true] %s280_s13  ;;  %s267_s17 = int_to_ptr.hbm [resolvable:$true] %s266_s17 }
   0x5   : > { %p3203_p3 = pnand %p2155_p0, %p246_p1  ;;  %s3134_s18 = smov [#allocation4]  }
   0x6   : > { %s282_s19 = sshll.u32 %s3134_s18, 4  ;;  %s3135_s20 = smov [#allocation2]   ;;  %s283_s19 = int_to_ptr.vmem [resolvable:$true] %s282_s19 }
   0x7   : > { %p2999_p4 = pneg %p3203_p3  ;;  %s268_s21 = sshll.u32 %s3135_s20, 4  ;;  %s269_s21 = int_to_ptr.vmem [resolvable:$true] %s268_s21 }
   0x8   : > { %s300_s24 = sshll.u32 %s3878_s8, 4  ;;  %s3136_s25 = smov 128   ;;  %s301_s24 = int_to_ptr.hbm [resolvable:$true] %s300_s24 }
   0x9   : > { %p3000_p5 = pnand %p3009_p2, %p2999_p4  ;;  %s3137_s26 = smov 8  }
   0xa   : > { %s3138_s27 = smov [#allocation6]   ;;  %326 = sbr.rel (%p3203_p3) target bundleno = 1005 (0x3ed), region = 56 }
   0xb   : > { %3005 = dma.hbm_to_vmem [thread:$0]  (!%p3000_p5), %s281_s13, 10240, %s283_s19, [#allocation5], %s3136_s25, %s3136_s25, %s3137_s26  }
   0xc   : > { %3002 = dma.hbm_to_vmem [thread:$0]  (!%p3000_p5), %s267_s17, 4096, %s269_s21, [#allocation3], %s3136_s25, %s3136_s25, %s3137_s26  }
   0xd   : > { %s302_s28 = sshll.u32 %s3138_s27, 4  ;;  %s303_s28 = int_to_ptr.vmem [resolvable:$true] %s302_s28 }
   0xe   : > { %3008 = dma.hbm_to_vmem [thread:$0]  (!%p3000_p5), %s301_s24, 4096, %s303_s28, [#allocation5], %s3136_s25, %s3136_s25, %s3137_s26  }
   0xf   : > { %3123 = dma.done.wait (%p3009_p2), [#allocation3], 4096  }
  0x10   : > { %3125 = vsyncadd (%p3009_p2), [#allocation3], 4294963200 }
  0x11   : > { %3127 = dma.done.wait (%p3009_p2), [#allocation5], 14336  }
  0x12   : > { %3129 = vsyncadd (%p3009_p2), [#allocation5], 4294952960  ;;  %p372_p6 = scmp.lt.s32.totalorder %s3195_s10, 1  ;;  %v2232_v0 = vld [vmem:[%s3871_s1 + $0x70] sm:$0xf]  ;;  %vm424_vm1 = vcmask 1046528  }
  0x13   : > { %v2841_v1 = vld [vmem:[%s3871_s1 + $0x74] sm:$0xf0]  ;;  %v2296_v2 = vld [vmem:[%s3871_s1 + $0xf0] sm:$0xf]  ;;  %v2224_v11 = vld [vmem:[%s3871_s1 + $0x60] sm:$0xf] }
  0x14   : > { %v2233_v3 = vor.u32 %v2841_v1, %v2232_v0  ;;  %v2857_v4 = vld [vmem:[%s3871_s1 + $0xf4] sm:$0xf0]  ;;  %v2360_v5 = vld [vmem:[%s3871_s1 + $0x170] sm:$0xf]  ;;  %v2839_v13 = vld [vmem:[%s3871_s1 + $0x64] sm:$0xf0] }
  0x15   : > { %v2873_v6 = vld [vmem:[%s3871_s1 + $0x174] sm:$0xf0]  ;;  %v2297_v7 = vor.u32 %v2857_v4, %v2296_v2  ;;  %v2424_v9 = vld [vmem:[%s3871_s1 + $0x1f0] sm:$0xf]  ;;  %v2288_v14 = vld [vmem:[%s3871_s1 + $0xe0] sm:$0xf]  ;;  %v2225_v16 = vor.u32 %v2839_v13, %v2224_v11 }
  0x16   : > { %v2361_v8 = vor.u32 %v2873_v6, %v2360_v5  ;;  %v2889_v10 = vld [vmem:[%s3871_s1 + $0x1f4] sm:$0xf0]  ;;  %942 = vmatpush.bf16.msra.mxu0 %v2233_v3  ;;  %v2855_v15 = vld [vmem:[%s3871_s1 + $0xe4] sm:$0xf0]  ;;  %v2352_v18 = vld [vmem:[%s3871_s1 + $0x160] sm:$0xf] }
  0x17   : > { %v2425_v12 = vor.u32 %v2889_v10, %v2424_v9  ;;  %961 = vmatpush.bf16.msra.mxu1 %v2297_v7  ;;  %v2289_v17 = vor.u32 %v2855_v15, %v2288_v14  ;;  %v2871_v19 = vld [vmem:[%s3871_s1 + $0x164] sm:$0xf0]  ;;  %v2416_v20 = vld [vmem:[%s3871_s1 + $0x1e0] sm:$0xf]  ;;  %v2216_v23 = vld [vmem:[%s3871_s1 + $0x50] sm:$0xf] }
  0x18   : > { %980 = vmatpush.bf16.msra.mxu2 %v2361_v8  ;;  %v2353_v21 = vor.u32 %v2871_v19, %v2352_v18  ;;  %v2887_v22 = vld [vmem:[%s3871_s1 + $0x1e4] sm:$0xf0]  ;;  %v2837_v24 = vld [vmem:[%s3871_s1 + $0x54] sm:$0xf0]  ;;  %v2280_v26 = vld [vmem:[%s3871_s1 + $0xd0] sm:$0xf] }
  0x19   : > { %999 = vmatpush.bf16.msra.mxu3 %v2425_v12  ;;  %v2417_v25 = vor.u32 %v2887_v22, %v2416_v20  ;;  %v2853_v27 = vld [vmem:[%s3871_s1 + $0xd4] sm:$0xf0]  ;;  %v2344_v28 = vld [vmem:[%s3871_s1 + $0x150] sm:$0xf]  ;;  %v2217_v29 = vor.u32 %v2837_v24, %v2216_v23  ;;  %v2208_v35 = vld [vmem:[%s3871_s1 + $0x40] sm:$0xf] }
  0x1a   : > { %943 = vmatpush.bf16.msra.mxu0 %v2225_v16  ;;  %v2869_v30 = vld [vmem:[%s3871_s1 + $0x154] sm:$0xf0]  ;;  %v2408_v31 = vld [vmem:[%s3871_s1 + $0x1d0] sm:$0xf]  ;;  %v2281_v33 = vor.u32 %v2853_v27, %v2280_v26  ;;  %v2835_v36 = vld [vmem:[%s3871_s1 + $0x44] sm:$0xf0] }
  0x1b   : > { %v2885_v32 = vld [vmem:[%s3871_s1 + $0x1d4] sm:$0xf0]  ;;  %962 = vmatpush.bf16.msra.mxu1 %v2289_v17  ;;  %v2345_v34 = vor.u32 %v2869_v30, %v2344_v28  ;;  %v2272_v37 = vld [vmem:[%s3871_s1 + $0xc0] sm:$0xf]  ;;  %v2851_v39 = vld [vmem:[%s3871_s1 + $0xc4] sm:$0xf0]  ;;  %v2209_v44 = vor.u32 %v2835_v36, %v2208_v35 }
  0x1c   : > { %981 = vmatpush.bf16.msra.mxu2 %v2353_v21  ;;  %v2409_v38 = vor.u32 %v2885_v32, %v2408_v31  ;;  %v2336_v40 = vld [vmem:[%s3871_s1 + $0x140] sm:$0xf]  ;;  %v2867_v41 = vld [vmem:[%s3871_s1 + $0x144] sm:$0xf0]  ;;  %s3882_s10 = smov (!%p372_p6, %s3195_s10), 1  ;;  %v2273_v45 = vor.u32 %v2851_v39, %v2272_v37  ;;  %vm448_vm3 = vcmask 1045504  }
  0x1d   : > { %1000 = vmatpush.bf16.msra.mxu3 %v2417_v25  ;;  %v2400_v42 = vld [vmem:[%s3871_s1 + $0x1c0] sm:$0xf]  ;;  %v2883_v43 = vld [vmem:[%s3871_s1 + $0x1c4] sm:$0xf0]  ;;  %v2337_v46 = vor.u32 %v2867_v41, %v2336_v40  ;;  %v2200_v47 = vld [vmem:[%s3871_s1 + $0x30] sm:$0xf] }
  0x1e   : > { %944 = vmatpush.bf16.msra.mxu0 %v2217_v29  ;;  %v2833_v48 = vld [vmem:[%s3871_s1 + $0x34] sm:$0xf0]  ;;  %v2264_v49 = vld [vmem:[%s3871_s1 + $0xb0] sm:$0xf]  ;;  %v2401_v50 = vor.u32 %v2883_v43, %v2400_v42  ;;  %s2986_s14 = smul.u32 20, %s3882_s10  ;;  %vm1135_vm4 = vcmask 261120  }
  0x1f   : > { %963 = vmatpush.bf16.msra.mxu1 %v2281_v33  ;;  %v2849_v51 = vld [vmem:[%s3871_s1 + $0xb4] sm:$0xf0]  ;;  %v2328_v52 = vld [vmem:[%s3871_s1 + $0x130] sm:$0xf]  ;;  %v2201_v56 = vor.u32 %v2833_v48, %v2200_v47  ;;  %v2192_v57 = vld [vmem:[%s3871_s1 + $0x20] sm:$0xf] }
  0x20   : > { %982 = vmatpush.bf16.msra.mxu2 %v2345_v34  ;;  %v2865_v53 = vld [vmem:[%s3871_s1 + $0x134] sm:$0xf0]  ;;  %v2392_v54 = vld [vmem:[%s3871_s1 + $0x1b0] sm:$0xf]  ;;  %v2265_v58 = vor.u32 %v2849_v51, %v2264_v49  ;;  %v2831_v60 = vld [vmem:[%s3871_s1 + $0x24] sm:$0xf0]  ;;  %s3387_s19 = scalar_lea.vmem %s3870_s0, %s2986_s14 }
  0x21   : > { %1001 = vmatpush.bf16.msra.mxu3 %v2409_v38  ;;  %v2881_v55 = vld [vmem:[%s3871_s1 + $0x1b4] sm:$0xf0]  ;;  %v2329_v59 = vor.u32 %v2865_v53, %v2328_v52  ;;  %v2256_v61 = vld [vmem:[%s3871_s1 + $0xa0] sm:$0xf]  ;;  %v2847_v62 = vld [vmem:[%s3871_s1 + $0xa4] sm:$0xf0]  ;;  %v2193_v6 = vor.u32 %v2831_v60, %v2192_v57 }
  0x22   : > { %945 = vmatpush.bf16.msra.mxu0 %v2209_v44  ;;  %v2393_v63 = vor.u32 %v2881_v55, %v2392_v54  ;;  %v2320_v0 = vld [vmem:[%s3871_s1 + $0x120] sm:$0xf]  ;;  %v2863_v1 = vld [vmem:[%s3871_s1 + $0x124] sm:$0xf0]  ;;  %v2184_v4 = vld [vmem:[%s3871_s1 + $0x10] sm:$0xf]  ;;  %v2257_v10 = vor.u32 %v2847_v62, %v2256_v61 }
  0x23   : > { %964 = vmatpush.bf16.msra.mxu1 %v2273_v45  ;;  %v2384_v2 = vld [vmem:[%s3871_s1 + $0x1a0] sm:$0xf]  ;;  %v2879_v3 = vld [vmem:[%s3871_s1 + $0x1a4] sm:$0xf0]  ;;  %v2829_v5 = vld [vmem:[%s3871_s1 + $0x14] sm:$0xf0]  ;;  %v2321_v11 = vor.u32 %v2863_v1, %v2320_v0 }
  0x24   : > { %983 = vmatpush.bf16.msra.mxu2 %v2337_v46  ;;  %v2248_v7 = vld [vmem:[%s3871_s1 + $0x90] sm:$0xf]  ;;  %v2845_v8 = vld [vmem:[%s3871_s1 + $0x94] sm:$0xf0]  ;;  %v2385_v15 = vor.u32 %v2879_v3, %v2384_v2  ;;  %v2176_v16 = vld [vmem:[%s3871_s1] sm:$0xf]  ;;  %v2185_v23 = vor.u32 %v2829_v5, %v2184_v4 }
  0x25   : > { %1002 = vmatpush.bf16.msra.mxu3 %v2401_v50  ;;  %v2312_v9 = vld [vmem:[%s3871_s1 + $0x110] sm:$0xf]  ;;  %v2861_v12 = vld [vmem:[%s3871_s1 + $0x114] sm:$0xf0]  ;;  %v2827_v17 = vld [vmem:[%s3871_s1 + $0x4] sm:$0xf0]  ;;  %v2249_v28 = vor.u32 %v2845_v8, %v2248_v7 }
  0x26   : > { %946 = vmatpush.bf16.msra.mxu0 %v2201_v56  ;;  %v2376_v13 = vld [vmem:[%s3871_s1 + $0x190] sm:$0xf]  ;;  %v2877_v14 = vld [vmem:[%s3871_s1 + $0x194] sm:$0xf0]  ;;  %v3414_v18 = vld [vmem:[%s3387_s19] sm:$0xff]  ;;  %v2313_v29 = vor.u32 %v2861_v12, %v2312_v9  ;;  %v2177_v35 = vor.u32 %v2827_v17, %v2176_v16  ;;  %vm1951_vm5 = vcmask 130048  }
  0x27   : > { %965 = vmatpush.bf16.msra.mxu1 %v2265_v58  ;;  %v3417_v19 = vld [vmem:[%s3387_s19 + $0x8] sm:$0xff]  ;;  %v2240_v20 = vld [vmem:[%s3871_s1 + $0x80] sm:$0xf]  ;;  %v403_v25 = vshrl.u32 %v3414_v18, 16  ;;  %v405_v26 = vshll.u32 %v3414_v18, 16  ;;  %v2377_v33 = vor.u32 %v2877_v14, %v2376_v13  ;;  %v425_v49 = vrot.slane %v3414_v18, 1 }
  0x28   : > { %984 = vmatpush.bf16.msra.mxu2 %v2329_v59  ;;  %v2843_v21 = vld [vmem:[%s3871_s1 + $0x84] sm:$0xf0]  ;;  %v2304_v22 = vld [vmem:[%s3871_s1 + $0x100] sm:$0xf]  ;;  %v410_v27 = vshll.u32 %v3417_v19, 16  ;;  %v414_v32 = vshrl.u32 %v3417_v19, 16 }
  0x29   : > { %1003 = vmatpush.bf16.msra.mxu3 %v2393_v63  ;;  %v2859_v24 = vld [vmem:[%s3871_s1 + $0x104] sm:$0xf0]  ;;  %v2368_v30 = vld [vmem:[%s3871_s1 + $0x180] sm:$0xf]  ;;  %vm401_vm0 = vsmask.f32 7424  ;;  %v2241_v36 = vor.u32 %v2843_v21, %v2240_v20 }
  0x2a   : > { %947 = vmatpush.bf16.msra.mxu0 %v2193_v6  ;;  %v2875_v31 = vld [vmem:[%s3871_s1 + $0x184] sm:$0xf0]  ;;  %v407_v34 = vrot.slane %v405_v26, 1  ;;  %v2488_v37 = vld [vmem:[%s3871_s1 + $0x270] sm:$0xf]  ;;  %v433_v39 = vrot.slane %v403_v25, 1  ;;  %v2305_v41 = vor.u32 %v2859_v24, %v2304_v22 }
  0x2b   : > { %966 = vmatpush.bf16.msra.mxu1 %v2257_v10  ;;  %v2905_v38 = vld [vmem:[%s3871_s1 + $0x274] sm:$0xf0]  ;;  %v434_v40 = vrot.slane %v405_v26, 2  ;;  %v2369_v42 = vor.u32 %v2875_v31, %v2368_v30  ;;  %v2840_v43 = vld [vmem:[%s3871_s1 + $0x74] sm:$0xf]  ;;  %v436_v45 = vrot.slane %v414_v32, 1 }
  0x2c   : > { %985 = vmatpush.bf16.msra.mxu2 %v2321_v11  ;;  %v2234_v44 = vld [vmem:[%s3871_s1 + $0x78] sm:$0xf0]  ;;  %v437_v46 = vrot.slane %v410_v27, 2  ;;  %v408_v47 = vor.u32 %v407_v34, %v403_v25  ;;  %v3455_v48 = vrot.slane %v410_v27, 1  ;;  %v426_v50 = vrot.slane %v3417_v19, 1  ;;  %s2165_s26 = sshll.u32 %s3882_s10, 2 }
  0x2d   : > { %1004 = vmatpush.bf16.msra.mxu3 %v2385_v15  ;;  %v2856_v51 = vld [vmem:[%s3871_s1 + $0xf4] sm:$0xf]  ;;  %v2489_v52 = vor.u32 %v2905_v38, %v2488_v37  ;;  %v2298_v53 = vld [vmem:[%s3871_s1 + $0xf8] sm:$0xf0]  ;;  %vm432_vm2 = vsmask.f32 6400  ;;  %v435_v54 = vor.u32 %v434_v40, %v433_v39  ;;  %v2237_v57 = vor.u32 %v2840_v43, %v2234_v44  ;;  %s380_s29 = scalar_lea.vmem %s3879_s9, %s2165_s26 }
  0x2e   : > { %948 = vmatpush.bf16.msra.mxu0 %v2185_v23  ;;  %v3465_v55 = vor.u32 %v437_v46, %v436_v45  ;;  %v2872_v56 = vld [vmem:[%s3871_s1 + $0x174] sm:$0xf]  ;;  %v2362_v58 = vld [vmem:[%s3871_s1 + $0x178] sm:$0xf0]  ;;  %v2480_v59 = vld [vmem:[%s3871_s1 + $0x260] sm:$0xf]  ;;  %v3487_v63 = vsel %vm401_vm0, %v408_v47, %v3455_v48  ;;  %v3492_v0 = vsel %vm424_vm1, %v425_v49, %v426_v50  ;;  %v2301_v1 = vor.u32 %v2856_v51, %v2298_v53 }
  0x2f   : > { %967 = vmatpush.bf16.msra.mxu1 %v2249_v28  ;;  %v2903_v60 = vld [vmem:[%s3871_s1 + $0x264] sm:$0xf0]  ;;  %v2838_v61 = vld [vmem:[%s3871_s1 + $0x64] sm:$0xf]  ;;  %v2226_v62 = vld [vmem:[%s3871_s1 + $0x68] sm:$0xf0]  ;;  %v2365_v3 = vor.u32 %v2872_v56, %v2362_v58  ;;  %v416_v51 = vor.u32 %v414_v32, %v3455_v48 }
  0x30   : > { %986 = vmatpush.bf16.msra.mxu2 %v2313_v29  ;;  %v3496_v2 = vsel %vm432_vm2, %v435_v54, %v3465_v55  ;;  %v2481_v4 = vor.u32 %v2903_v60, %v2480_v59  ;;  %v2854_v5 = vld [vmem:[%s3871_s1 + $0xe4] sm:$0xf]  ;;  %v2290_v6 = vld [vmem:[%s3871_s1 + $0xe8] sm:$0xf0]  ;;  %v2229_v8 = vor.u32 %v2838_v61, %v2226_v62  ;;  %v2472_v10 = vld [vmem:[%s3871_s1 + $0x250] sm:$0xf] }
  0x31   : > { %1005 = vmatpush.bf16.msra.mxu3 %v2377_v33  ;;  %v2870_v7 = vld [vmem:[%s3871_s1 + $0x164] sm:$0xf]  ;;  %v2354_v9 = vld [vmem:[%s3871_s1 + $0x168] sm:$0xf0]  ;;  %v2901_v11 = vld [vmem:[%s3871_s1 + $0x254] sm:$0xf0]  ;;  %v2293_v15 = vor.u32 %v2854_v5, %v2290_v6 }
  0x32   : > { %949 = vmatpush.bf16.msra.mxu0 %v2177_v35  ;;  %v2836_v12 = vld [vmem:[%s3871_s1 + $0x54] sm:$0xf]  ;;  %v2218_v13 = vld [vmem:[%s3871_s1 + $0x58] sm:$0xf0]  ;;  %v385_v14 = vld [vmem:[%s3387_s19 + $0x10] sm:$0xf]  ;;  %v2357_v17 = vor.u32 %v2870_v7, %v2354_v9  ;;  %v2473_v20 = vor.u32 %v2901_v11, %v2472_v10 }
  0x33   : > { %968 = vmatpush.bf16.msra.mxu1 %v2241_v36  ;;  %v399_v16 = vunpack.c.l.b16 %v385_v14  ;;  %v2852_v21 = vld [vmem:[%s3871_s1 + $0xd4] sm:$0xf]  ;;  %v2282_v22 = vld [vmem:[%s3871_s1 + $0xd8] sm:$0xf0]  ;;  %v2221_v24 = vor.u32 %v2836_v12, %v2218_v13  ;;  %v2464_v26 = vld [vmem:[%s3871_s1 + $0x240] sm:$0xf] }
  0x34   : > { %987 = vmatpush.bf16.msra.mxu2 %v2305_v41  ;;  %v2868_v23 = vld [vmem:[%s3871_s1 + $0x154] sm:$0xf]  ;;  %v2346_v25 = vld [vmem:[%s3871_s1 + $0x158] sm:$0xf0]  ;;  %v2899_v27 = vld [vmem:[%s3871_s1 + $0x244] sm:$0xf0]  ;;  %v2285_v31 = vor.u32 %v2852_v21, %v2282_v22 }
  0x35   : > { %1006 = vmatpush.bf16.msra.mxu3 %v2369_v42  ;;  %950 = vmatmul.bf16.vlgmr.msra.gmra.mxu0 %v3414_v18  ;;  %v3545_v28 = vpack.c.b16 %v399_v16, %v399_v16  ;;  %v2834_v29 = vld [vmem:[%s3871_s1 + $0x44] sm:$0xf]  ;;  %v2210_v30 = vld [vmem:[%s3871_s1 + $0x48] sm:$0xf0]  ;;  %v2349_v36 = vor.u32 %v2868_v23, %v2346_v25  ;;  %v2465_v37 = vor.u32 %v2899_v27, %v2464_v26  ;;  %v2456_v42 = vld [vmem:[%s3871_s1 + $0x230] sm:$0xf] }
  0x36   : > { %1018 = vmatpush.bf16.msrb.mxu0 %v2489_v52  ;;  %969 = vmatmul.bf16.vlgmr.msra.gmra.mxu1 %v3487_v63  ;;  %v2850_v33 = vld [vmem:[%s3871_s1 + $0xc4] sm:$0xf]  ;;  %v2274_v38 = vld [vmem:[%s3871_s1 + $0xc8] sm:$0xf0]  ;;  %v2213_v41 = vor.u32 %v2834_v29, %v2210_v30  ;;  %v2897_v43 = vld [vmem:[%s3871_s1 + $0x234] sm:$0xf0] }
  0x37   : > { %1037 = vmatpush.bf16.msrb.mxu1 %v2237_v57  ;;  %988 = vmatmul.bf16.vlgmr.msra.gmra.mxu2 %v3492_v0  ;;  %v418_v34 = vshll.u32 %v3545_v28, 16  ;;  %v440_v35 = vshrl.u32 %v3545_v28, 16  ;;  %v2866_v39 = vld [vmem:[%s3871_s1 + $0x144] sm:$0xf]  ;;  %v2338_v40 = vld [vmem:[%s3871_s1 + $0x148] sm:$0xf0]  ;;  %v2277_v49 = vor.u32 %v2850_v33, %v2274_v38  ;;  %v2457_v56 = vor.u32 %v2897_v43, %v2456_v42 }
  0x38   : > { %1056 = vmatpush.bf16.msrb.mxu2 %v2301_v1  ;;  %1007 = vmatmul.bf16.vlgmr.msra.gmra.mxu3 %v3496_v2  ;;  %v2832_v46 = vld [vmem:[%s3871_s1 + $0x34] sm:$0xf]  ;;  %v2202_v47 = vld [vmem:[%s3871_s1 + $0x38] sm:$0xf0]  ;;  %v428_v53 = vrot.slane %v3545_v28, 1  ;;  %v2341_v54 = vor.u32 %v2866_v39, %v2338_v40 }
  0x39   : > { %1075 = vmatpush.bf16.msrb.mxu3 %v2365_v3  ;;  %v442_v44 = vrot.slane %v440_v35, 1  ;;  %v443_v45 = vrot.slane %v418_v34, 2  ;;  %v420_v52 = vrot.slane %v418_v34, 1  ;;  %v2848_v57 = vld [vmem:[%s3871_s1 + $0xb4] sm:$0xf]  ;;  %v2205_v48 = vor.u32 %v2832_v46, %v2202_v47 }
  0x3a   : > { %1019 = vmatpush.bf16.msrb.mxu0 %v2481_v4  ;;  %v2266_v58 = vld [vmem:[%s3871_s1 + $0xb8] sm:$0xf0]  ;;  %v2864_v32 = vld [vmem:[%s3871_s1 + $0x134] sm:$0xf]  ;;  %v2448_v61 = vld [vmem:[%s3871_s1 + $0x220] sm:$0xf]  ;;  %v3613_v5 = vsel %vm424_vm1, %v426_v50, %v428_v53 }
  0x3b   : > { %1038 = vmatpush.bf16.msrb.mxu1 %v2229_v8  ;;  %v444_v59 = vor.u32 %v443_v45, %v442_v44  ;;  %v2330_v60 = vld [vmem:[%s3871_s1 + $0x138] sm:$0xf0]  ;;  %v2895_v62 = vld [vmem:[%s3871_s1 + $0x224] sm:$0xf0]  ;;  %v2830_v1 = vld [vmem:[%s3871_s1 + $0x24] sm:$0xf]  ;;  %v3608_v4 = vsel %vm401_vm0, %v416_v51, %v420_v52  ;;  %v2269_v6 = vor.u32 %v2848_v57, %v2266_v58 }
  0x3c   : > { %1057 = vmatpush.bf16.msrb.mxu2 %v2293_v15  ;;  %v2194_v3 = vld [vmem:[%s3871_s1 + $0x28] sm:$0xf0]  ;;  %v2333_v8 = vor.u32 %v2864_v32, %v2330_v60  ;;  %v2449_v9 = vor.u32 %v2895_v62, %v2448_v61  ;;  %v2846_v10 = vld [vmem:[%s3871_s1 + $0xa4] sm:$0xf]  ;;  %v2440_v13 = vld [vmem:[%s3871_s1 + $0x210] sm:$0xf] }
  0x3d   : > { %1076 = vmatpush.bf16.msrb.mxu3 %v2357_v17  ;;  %v3617_v7 = vsel %vm432_vm2, %v3465_v55, %v444_v59  ;;  %v2258_v11 = vld [vmem:[%s3871_s1 + $0xa8] sm:$0xf0]  ;;  %v2862_v50 = vld [vmem:[%s3871_s1 + $0x124] sm:$0xf]  ;;  %v2197_v12 = vor.u32 %v2830_v1, %v2194_v3  ;;  %v2893_v14 = vld [vmem:[%s3871_s1 + $0x214] sm:$0xf0] }
  0x3e   : > { %1020 = vmatpush.bf16.msrb.mxu0 %v2473_v20  ;;  %v2322_v55 = vld [vmem:[%s3871_s1 + $0x128] sm:$0xf0]  ;;  %v2828_v15 = vld [vmem:[%s3871_s1 + $0x14] sm:$0xf]  ;;  %v2186_v16 = vld [vmem:[%s3871_s1 + $0x18] sm:$0xf0]  ;;  %v2261_v17 = vor.u32 %v2846_v10, %v2258_v11  ;;  %v2441_v22 = vor.u32 %v2893_v14, %v2440_v13 }
  0x3f   : > { %1039 = vmatpush.bf16.msrb.mxu1 %v2221_v24  ;;  %v2844_v20 = vld [vmem:[%s3871_s1 + $0x94] sm:$0xf]  ;;  %v2325_v21 = vor.u32 %v2862_v50, %v2322_v55  ;;  %v2250_v23 = vld [vmem:[%s3871_s1 + $0x98] sm:$0xf0]  ;;  %v2189_v26 = vor.u32 %v2828_v15, %v2186_v16  ;;  %v2432_v27 = vld [vmem:[%s3871_s1 + $0x200] sm:$0xf] }
  0x40   : > { %1058 = vmatpush.bf16.msrb.mxu2 %v2285_v31  ;;  %v2860_v24 = vld [vmem:[%s3871_s1 + $0x114] sm:$0xf]  ;;  %v2314_v25 = vld [vmem:[%s3871_s1 + $0x118] sm:$0xf0]  ;;  %v2891_v29 = vld [vmem:[%s3871_s1 + $0x204] sm:$0xf0]  ;;  %v2253_v35 = vor.u32 %v2844_v20, %v2250_v23 }
  0x41   : > { %1077 = vmatpush.bf16.msrb.mxu3 %v2349_v36  ;;  %v2826_v30 = vld [vmem:[%s3871_s1 + $0x4] sm:$0xf]  ;;  %v2178_v31 = vld [vmem:[%s3871_s1 + $0x8] sm:$0xf0]  ;;  %v2888_v33 = vld [vmem:[%s3871_s1 + $0x1f4] sm:$0xf]  ;;  %v2317_v38 = vor.u32 %v2860_v24, %v2314_v25  ;;  %v2433_v39 = vor.u32 %v2891_v29, %v2432_v27 }
  0x42   : > { %1021 = vmatpush.bf16.msrb.mxu0 %v2465_v37  ;;  %v2426_v34 = vld [vmem:[%s3871_s1 + $0x1f8] sm:$0xf0]  ;;  %v2904_v36 = vld [vmem:[%s3871_s1 + $0x274] sm:$0xf]  ;;  %v2842_v40 = vld [vmem:[%s3871_s1 + $0x84] sm:$0xf]  ;;  %v2181_v42 = vor.u32 %v2826_v30, %v2178_v31 }
  0x43   : > { %1040 = vmatpush.bf16.msrb.mxu1 %v2213_v41  ;;  %v2490_v37 = vld [vmem:[%s3871_s1 + $0x278] sm:$0xf0]  ;;  %v2242_v41 = vld [vmem:[%s3871_s1 + $0x88] sm:$0xf0]  ;;  %v2858_v43 = vld [vmem:[%s3871_s1 + $0x104] sm:$0xf]  ;;  %v2429_v45 = vor.u32 %v2888_v33, %v2426_v34 }
  0x44   : > { %1059 = vmatpush.bf16.msrb.mxu2 %v2277_v49  ;;  %v2306_v44 = vld [vmem:[%s3871_s1 + $0x108] sm:$0xf0]  ;;  %v449_v46 = vrot.slane %v3414_v18, 2  ;;  %v450_v47 = vrot.slane %v3417_v19, 2  ;;  %v2493_v49 = vor.u32 %v2904_v36, %v2490_v37  ;;  %v2245_v51 = vor.u32 %v2842_v40, %v2242_v41  ;;  %v2886_v53 = vld [vmem:[%s3871_s1 + $0x1e4] sm:$0xf] }
  0x45   : > { %1078 = vmatpush.bf16.msrb.mxu3 %v2341_v54  ;;  %955 = vmatmul.bf16.gmra.mxu0 %v3417_v19  ;;  %v2309_v52 = vor.u32 %v2858_v43, %v2306_v44  ;;  %v2418_v54 = vld [vmem:[%s3871_s1 + $0x1e8] sm:$0xf0]  ;;  %v2410_v60 = vld [vmem:[%s3871_s1 + $0x1d8] sm:$0xf0]  ;;  %v2900_v61 = vld [vmem:[%s3871_s1 + $0x254] sm:$0xf] }
  0x46   : > { %1022 = vmatpush.bf16.msrb.mxu0 %v2457_v56  ;;  %974 = vmatmul.bf16.gmra.mxu1 %v3608_v4  ;;  %v2902_v56 = vld [vmem:[%s3871_s1 + $0x264] sm:$0xf]  ;;  %v2482_v57 = vld [vmem:[%s3871_s1 + $0x268] sm:$0xf0]  ;;  %v3710_v58 = vsel %vm448_vm3, %v449_v46, %v450_v47  ;;  %v2421_v59 = vor.u32 %v2886_v53, %v2418_v54  ;;  %v2474_v62 = vld [vmem:[%s3871_s1 + $0x258] sm:$0xf0] }
  0x47   : > { %1041 = vmatpush.bf16.msrb.mxu1 %v2205_v48  ;;  %993 = vmatmul.bf16.gmra.mxu2 %v3613_v5  ;;  %v2485_v32 = vor.u32 %v2902_v56, %v2482_v57  ;;  %v2884_v48 = vld [vmem:[%s3871_s1 + $0x1d4] sm:$0xf]  ;;  %v2477_v3 = vor.u32 %v2900_v61, %v2474_v62  ;;  %v2394_v11 = vld [vmem:[%s3871_s1 + $0x1b8] sm:$0xf0]  ;;  %v452_v55 = vrot.slane %v3545_v28, 2 }
  0x48   : > { %1060 = vmatpush.bf16.msrb.mxu2 %v2269_v6  ;;  %1012 = vmatmul.bf16.gmra.mxu3 %v3617_v7  ;;  %v2413_v1 = vor.u32 %v2884_v48, %v2410_v60  ;;  %v2882_v6 = vld [vmem:[%s3871_s1 + $0x1c4] sm:$0xf]  ;;  %v2880_v10 = vld [vmem:[%s3871_s1 + $0x1b4] sm:$0xf]  ;;  %v2386_v16 = vld [vmem:[%s3871_s1 + $0x1a8] sm:$0xf0] }
  0x49   : > { %1079 = vmatpush.bf16.msrb.mxu3 %v2333_v8  ;;  %v2402_v8 = vld [vmem:[%s3871_s1 + $0x1c8] sm:$0xf0]  ;;  %v2896_v50 = vld [vmem:[%s3871_s1 + $0x234] sm:$0xf]  ;;  %v2397_v13 = vor.u32 %v2880_v10, %v2394_v11  ;;  %v2878_v15 = vld [vmem:[%s3871_s1 + $0x1a4] sm:$0xf]  ;;  %v453_v20 = vsel %vm448_vm3, %v450_v47, %v452_v55 }
  0x4a   : > { %1023 = vmatpush.bf16.msrb.mxu0 %v2449_v9  ;;  %v2450_v28 = vld [vmem:[%s3871_s1 + $0x228] sm:$0xf0]  ;;  %v2876_v23 = vld [vmem:[%s3871_s1 + $0x194] sm:$0xf]  ;;  %v2378_v24 = vld [vmem:[%s3871_s1 + $0x198] sm:$0xf0] }
  0x4b   : > { %1042 = vmatpush.bf16.msrb.mxu1 %v2197_v12  ;;  %v2458_v12 = vld [vmem:[%s3871_s1 + $0x238] sm:$0xf0]  ;;  %v2892_v25 = vld [vmem:[%s3871_s1 + $0x214] sm:$0xf]  ;;  %v2381_v27 = vor.u32 %v2876_v23, %v2378_v24  ;;  %v2874_v30 = vld [vmem:[%s3871_s1 + $0x184] sm:$0xf] }
  0x4c   : > { %1061 = vmatpush.bf16.msrb.mxu2 %v2261_v17  ;;  %v2461_v14 = vor.u32 %v2896_v50, %v2458_v12  ;;  %v2894_v17 = vld [vmem:[%s3871_s1 + $0x224] sm:$0xf]  ;;  %v2370_v31 = vld [vmem:[%s3871_s1 + $0x188] sm:$0xf0] }
  0x4d   : > { %1080 = vmatpush.bf16.msrb.mxu3 %v2325_v21  ;;  %v2389_v21 = vor.u32 %v2878_v15, %v2386_v16  ;;  %v3808_v23 = vld [vmem:[%s3873_s3] sm:$0xff] }
  0x4e   : > { %1024 = vmatpush.bf16.msrb.mxu0 %v2441_v22  ;;  %v2453_v22 = vor.u32 %v2894_v17, %v2450_v28 }
  0x4f   : > { %1043 = vmatpush.bf16.msrb.mxu1 %v2189_v26  ;;  %v2442_v26 = vld [vmem:[%s3871_s1 + $0x218] sm:$0xf0] }
  0x50   : > { %1062 = vmatpush.bf16.msrb.mxu2 %v2253_v35  ;;  %v2445_v29 = vor.u32 %v2892_v25, %v2442_v26 }
  0x51   : > { %1081 = vmatpush.bf16.msrb.mxu3 %v2317_v38 }
  0x52   : > { %1025 = vmatpush.bf16.msrb.mxu0 %v2433_v39 }
  0x53   : > { %1044 = vmatpush.bf16.msrb.mxu1 %v2181_v42 }
  0x54   : > { %1063 = vmatpush.bf16.msrb.mxu2 %v2245_v51 }
  0x55   : > { %1082 = vmatpush.bf16.msrb.mxu3 %v2309_v52  ;;  %1026 = vmatmul.bf16.vlgmr.msrb.gmra.mxu0 %v3710_v58 }
  0x56   : > { %1094 = vmatpush.bf16.msra.mxu0 %v2429_v45  ;;  %1045 = vmatmul.bf16.vlgmr.msrb.gmra.mxu1 %v3414_v18  ;;  %v2898_v18 = vld [vmem:[%s3871_s1 + $0x244] sm:$0xf] }
  0x57   : > { %1113 = vmatpush.bf16.msra.mxu1 %v2493_v49  ;;  %1064 = vmatmul.bf16.vlgmr.msrb.gmra.mxu2 %v3487_v63  ;;  %v2466_v63 = vld [vmem:[%s3871_s1 + $0x248] sm:$0xf0] }
  0x58   : > { %1083 = vmatmul.bf16.vlgmr.msrb.gmra.mxu3 %v3492_v0  ;;  %v2405_v0 = vor.u32 %v2882_v6, %v2402_v8  ;;  %v2469_v9 = vor.u32 %v2898_v18, %v2466_v63 }
  0x5a   : > { %1095 = vmatpush.bf16.msra.mxu0 %v2421_v59 }
  0x5b   : > { %1114 = vmatpush.bf16.msra.mxu1 %v2485_v32 }
  0x5e   : > { %1096 = vmatpush.bf16.msra.mxu0 %v2413_v1 }
  0x5f   : > { %1115 = vmatpush.bf16.msra.mxu1 %v2477_v3 }
  0x62   : > { %1097 = vmatpush.bf16.msra.mxu0 %v2405_v0 }
  0x63   : > { %1116 = vmatpush.bf16.msra.mxu1 %v2469_v9 }
  0x65   : > { %1031 = vmatmul.bf16.gmra.mxu0 %v453_v20 }
  0x66   : > { %1098 = vmatpush.bf16.msra.mxu0 %v2397_v13  ;;  %1050 = vmatmul.bf16.gmra.mxu1 %v3417_v19  ;;  %v2890_v19 = vld [vmem:[%s3871_s1 + $0x204] sm:$0xf] }
  0x67   : > { %1117 = vmatpush.bf16.msra.mxu1 %v2461_v14  ;;  %1069 = vmatmul.bf16.gmra.mxu2 %v3608_v4  ;;  %v2434_v4 = vld [vmem:[%s3871_s1 + $0x208] sm:$0xf0] }
  0x68   : > { %1088 = vmatmul.bf16.gmra.mxu3 %v3613_v5  ;;  %v2373_v5 = vor.u32 %v2874_v30, %v2370_v31  ;;  %v2437_v33 = vor.u32 %v2890_v19, %v2434_v4 }
  0x6a   : > { %1099 = vmatpush.bf16.msra.mxu0 %v2389_v21 }
  0x6b   : > { %1118 = vmatpush.bf16.msra.mxu1 %v2453_v22 }
  0x6e   : > { %1100 = vmatpush.bf16.msra.mxu0 %v2381_v27  ;;  %v3815_v27 = vld [vmem:[%s3873_s3 + $0x8] sm:$0xff] }
  0x6f   : > { %1119 = vmatpush.bf16.msra.mxu1 %v2445_v29 }
  0x72   : > { %1101 = vmatpush.bf16.msra.mxu0 %v2373_v5 }
  0x73   : > { %1120 = vmatpush.bf16.msra.mxu1 %v2437_v33 }
  0x75   : > { %1102 = vmatmul.bf16.vlgmr.msra.gmra.mxu0 %v3496_v2 }
  0x76   : > { %1121 = vmatmul.bf16.vlgmr.msra.gmra.mxu1 %v3710_v58 }
  0x85   : > { %1107 = vmatmul.bf16.gmra.mxu0 %v3617_v7  ;;  %v536_v7 = vld [vmem:[%s3872_s2] sm:$0x3] }
  0x86   : > { %1126 = vmatmul.bf16.gmra.mxu1 %v453_v20  ;;  %v538_v54 = vperm.slane %v536_v7, 0  ;;  %v539_v30 = vperm.slane %v536_v7, 1 }
  0xb2   : > { %v951_v34 = vpop.f32.mrf.mxu0 }
  0xb3   : > { %v970_v35 = vpop.f32.mrf.mxu1  ;;  %v952_v62 = vadd.f32 %v951_v34, %v538_v54  ;;  %v3822_v34 = vld [vmem:[%s3873_s3 + $0x10] sm:$0xff] }
  0xb5   : > { %v971_v63 = vadd.f32 %v970_v35, %v952_v62 }
  0xba   : > { %v953_v36 = vpop.f32.mrf.mxu0  ;;  %v989_v38 = vpop.f32.mrf.mxu2 }
  0xbb   : > { %v972_v37 = vpop.f32.mrf.mxu1  ;;  %v1008_v39 = vpop.f32.mrf.mxu3  ;;  %v954_v32 = vadd.f32 %v953_v36, %v538_v54  ;;  %v990_v11 = vadd.f32 %v989_v38, %v971_v63  ;;  %v1222_v63 = vld [vmem:[#allocation2 + $0xc8] sm:$0xff] }
  0xbd   : > { %v973_v6 = vadd.f32 %v972_v37, %v954_v32  ;;  %v1009_v16 = vadd.f32 %v1008_v39, %v990_v11  ;;  %v1212_v39 = vld [vmem:[#allocation2 + $0x78] sm:$0xff] }
  0xbe   : > { %1229 = vmatpush.msrb.mxu0 %v1212_v39  ;;  %v1220_v11 = vld [vmem:[#allocation2 + $0xb8] sm:$0xff]  ;;  %v2935_v39 = vld [vmem:[#allocation4 + $0xe4] sm:$0xf0] }
  0xc2   : > { %v956_v40 = vpop.f32.mrf.mxu0  ;;  %v991_v42 = vpop.f32.mrf.mxu2 }
  0xc3   : > { %v975_v41 = vpop.f32.mrf.mxu1  ;;  %v1010_v43 = vpop.f32.mrf.mxu3  ;;  %v957_v58 = vadd.f32 %v956_v40, %v538_v54  ;;  %v992_v0 = vadd.f32 %v991_v42, %v973_v6  ;;  %v1228_v40 = vld [vmem:[#allocation2 + $0xf8] sm:$0xff]  ;;  %v1206_v6 = vld [vmem:[#allocation2 + $0x48] sm:$0xff] }
  0xc4   : > { %1255 = vmatpush.msrb.mxu1 %v1228_v40 }
  0xc5   : > { %v976_v1 = vadd.f32 %v975_v41, %v957_v58  ;;  %v1011_v13 = vadd.f32 %v1010_v43, %v992_v0  ;;  %v1211_v41 = vld [vmem:[#allocation2 + $0x70] sm:$0xff]  ;;  %v1208_v58 = vld [vmem:[#allocation2 + $0x58] sm:$0xff]  ;;  %v1205_v0 = vld [vmem:[#allocation2 + $0x40] sm:$0xff] }
  0xc6   : > { %1230 = vmatpush.msrb.mxu0 %v1211_v41  ;;  %v2686_v41 = vld [vmem:[#allocation4 + $0x170] sm:$0xf] }
  0xca   : > { %v958_v44 = vpop.f32.mrf.mxu0  ;;  %v994_v46 = vpop.f32.mrf.mxu2 }
  0xcb   : > { %v977_v45 = vpop.f32.mrf.mxu1  ;;  %v1013_v49 = vpop.f32.mrf.mxu3  ;;  %v959_v57 = vadd.f32 %v958_v44, %v538_v54  ;;  %v995_v8 = vadd.f32 %v994_v46, %v976_v1  ;;  %v1227_v44 = vld [vmem:[#allocation2 + $0xf0] sm:$0xff]  ;;  %v1226_v46 = vld [vmem:[#allocation2 + $0xe8] sm:$0xff] }
  0xcc   : > { %1256 = vmatpush.msrb.mxu1 %v1227_v44  ;;  %v2933_v44 = vld [vmem:[#allocation4 + $0xd4] sm:$0xf0] }
  0xcd   : > { %v978_v48 = vadd.f32 %v977_v45, %v959_v57  ;;  %v1014_v50 = vadd.f32 %v1013_v49, %v995_v8  ;;  %v1210_v45 = vld [vmem:[#allocation2 + $0x68] sm:$0xff] }
  0xce   : > { %1231 = vmatpush.msrb.mxu0 %v1210_v45  ;;  %1257 = vmatpush.msrb.mxu1 %v1226_v46  ;;  %v2953_v45 = vld [vmem:[#allocation4 + $0x174] sm:$0xf0]  ;;  %v2534_v46 = vld [vmem:[#allocation4 + $0x40] sm:$0xf] }
  0xd2   : > { %v1027_v47 = vpop.f32.mrf.mxu0  ;;  %v996_v51 = vpop.f32.mrf.mxu2 }
  0xd3   : > { %v3796_v2 = vpop.f32.mrf.mxu1  ;;  %v1015_v56 = vpop.f32.mrf.mxu3  ;;  %v997_v3 = vadd.f32 %v996_v51, %v978_v48  ;;  %v1028_v28 = vadd.f32 %v1027_v47, %v1009_v16  ;;  %v1200_v16 = vld [vmem:[#allocation2 + $0x18] sm:$0xff] }
  0xd4   : > { %v1047_v42 = vadd.f32 %v3796_v2, %v539_v30 }
  0xd5   : > { %v1016_v9 = vadd.f32 %v1015_v56, %v997_v3  ;;  %v1223_v3 = vld [vmem:[#allocation2 + $0xd0] sm:$0xff] }
  0xda   : > { %v1029_v52 = vpop.f32.mrf.mxu0  ;;  %v1065_v61 = vpop.f32.mrf.mxu2 }
  0xdb   : > { %v1048_v53 = vpop.f32.mrf.mxu1  ;;  %v3801_v18 = vpop.f32.mrf.mxu3  ;;  %v1030_v17 = vadd.f32 %v1029_v52, %v1011_v13  ;;  %v1066_v47 = vadd.f32 %v1065_v61, %v1047_v42  ;;  %v1209_v52 = vld [vmem:[#allocation2 + $0x60] sm:$0xff]  ;;  %v1207_v61 = vld [vmem:[#allocation2 + $0x50] sm:$0xff]  ;;  %v1218_v13 = vld [vmem:[#allocation2 + $0xa8] sm:$0xff] }
  0xdc   : > { %v1049_v35 = vadd.f32 %v1048_v53, %v539_v30  ;;  %v1225_v53 = vld [vmem:[#allocation2 + $0xe0] sm:$0xff]  ;;  %1232 = vmatpush.msrb.mxu0 %v1209_v52  ;;  %v2750_v52 = vld [vmem:[#allocation4 + $0x1f0] sm:$0xf] }
  0xdd   : > { %1258 = vmatpush.msrb.mxu1 %v1225_v53  ;;  %v2969_v53 = vld [vmem:[#allocation4 + $0x1f4] sm:$0xf0] }
  0xde   : > { %1233 = vmatpush.msrb.mxu0 %v1208_v58  ;;  %v2751_v58 = vor.u32 %v2969_v53, %v2750_v52  ;;  %v2979_v52 = vld [vmem:[#allocation4 + $0x244] sm:$0xf0]  ;;  %v2920_v53 = vld [vmem:[#allocation4 + $0x74] sm:$0xf] }
  0xe0   : > { %1234 = vmatpush.msrb.mxu0 %v1207_v61  ;;  %v2913_v61 = vld [vmem:[#allocation4 + $0x34] sm:$0xf0] }
  0xe2   : > { %v1032_v59 = vpop.f32.mrf.mxu0  ;;  %v1067_v15 = vpop.f32.mrf.mxu2  ;;  %1235 = vmatpush.msrb.mxu0 %v1206_v6 }
  0xe3   : > { %v1051_v60 = vpop.f32.mrf.mxu1  ;;  %v1033_v14 = vadd.f32 %v1032_v59, %v1014_v50  ;;  %v1086_v20 = vpop.f32.mrf.mxu3  ;;  %v1068_v43 = vadd.f32 %v1067_v15, %v1049_v35  ;;  %v1085_v59 = vadd.f32 %v3801_v18, %v1066_v47  ;;  %v1203_v50 = vld [vmem:[#allocation2 + $0x30] sm:$0xff]  ;;  %v1217_v15 = vld [vmem:[#allocation2 + $0xa0] sm:$0xff]  ;;  %v2915_v47 = vld [vmem:[#allocation4 + $0x44] sm:$0xf0] }
  0xe4   : > { %v1052_v4 = vadd.f32 %v1051_v60, %v539_v30  ;;  %v1224_v60 = vld [vmem:[#allocation2 + $0xd8] sm:$0xff]  ;;  %1236 = vmatpush.msrb.mxu0 %v1205_v0  ;;  %v2542_v35 = vld [vmem:[#allocation4 + $0x50] sm:$0xf] }
  0xe5   : > { %v1087_v54 = vadd.f32 %v1086_v20, %v1068_v43  ;;  %1259 = vmatpush.msrb.mxu1 %v1224_v60  ;;  %v1215_v20 = vld [vmem:[#allocation2 + $0x90] sm:$0xff]  ;;  %v2949_v60 = vld [vmem:[#allocation4 + $0x154] sm:$0xf0] }
  0xe6   : > { %v2606_v43 = vld [vmem:[#allocation4 + $0xd0] sm:$0xf] }
  0xe7   : > { %1260 = vmatpush.msrb.mxu1 %v1223_v3 }
  0xe9   : > { %1261 = vmatpush.msrb.mxu1 %v1222_v63  ;;  %v2929_v63 = vld [vmem:[#allocation4 + $0xb4] sm:$0xf0] }
  0xea   : > { %v1034_v10 = vpop.f32.mrf.mxu0  ;;  %v1070_v24 = vpop.f32.mrf.mxu2 }
  0xeb   : > { %v1035_v12 = vadd.f32 %v1034_v10, %v1016_v9  ;;  %v1053_v55 = vpop.f32.mrf.mxu1  ;;  %v1089_v29 = vpop.f32.mrf.mxu3  ;;  %v1071_v36 = vadd.f32 %v1070_v24, %v1052_v4  ;;  %v1221_v9 = vld [vmem:[#allocation2 + $0xc0] sm:$0xff]  ;;  %v1204_v10 = vld [vmem:[#allocation2 + $0x38] sm:$0xff]  ;;  %v2919_v4 = vld [vmem:[#allocation4 + $0x64] sm:$0xf0] }
  0xec   : > { %v1054_v5 = vadd.f32 %v1053_v55, %v539_v30  ;;  %1262 = vmatpush.msrb.mxu1 %v1221_v9  ;;  %1237 = vmatpush.msrb.mxu0 %v1204_v10  ;;  %v1202_v55 = vld [vmem:[#allocation2 + $0x28] sm:$0xff]  ;;  %v1197_v24 = vld [vmem:[#allocation2] sm:$0xff]  ;;  %v2921_v30 = vld [vmem:[#allocation4 + $0x74] sm:$0xf0] }
  0xed   : > { %1157 = vmatpush.msra.mxu2 %v1035_v12  ;;  %v1090_v49 = vadd.f32 %v1089_v29, %v1071_v36  ;;  %v1219_v12 = vld [vmem:[#allocation2 + $0xb0] sm:$0xff]  ;;  %v2917_v36 = vld [vmem:[#allocation4 + $0x54] sm:$0xf0] }
  0xee   : > { %1263 = vmatpush.msrb.mxu1 %v1220_v11  ;;  %1238 = vmatpush.msrb.mxu0 %v1203_v50  ;;  %v2558_v29 = vld [vmem:[#allocation4 + $0x70] sm:$0xf]  ;;  %v2543_v42 = vor.u32 %v2917_v36, %v2542_v35  ;;  %v2662_v11 = vld [vmem:[#allocation4 + $0x140] sm:$0xf]  ;;  %v2947_v50 = vld [vmem:[#allocation4 + $0x144] sm:$0xf0] }
  0xef   : > { %1158 = vmatpush.msra.mxu2 %v1033_v14  ;;  %v1201_v14 = vld [vmem:[#allocation2 + $0x20] sm:$0xff] }
  0xf0   : > { %1264 = vmatpush.msrb.mxu1 %v1219_v12  ;;  %1239 = vmatpush.msrb.mxu0 %v1202_v55  ;;  %v2965_v12 = vld [vmem:[#allocation4 + $0x1d4] sm:$0xf0]  ;;  %v2518_v55 = vld [vmem:[#allocation4 + $0x20] sm:$0xf] }
  0xf1   : > { %1159 = vmatpush.msra.mxu2 %v1030_v17  ;;  %v1216_v17 = vld [vmem:[#allocation2 + $0x98] sm:$0xff]  ;;  %v2806_v35 = vld [vmem:[#allocation4 + $0x260] sm:$0xf] }
  0xf2   : > { %v1103_v21 = vpop.f32.mrf.mxu0  ;;  %v1072_v31 = vpop.f32.mrf.mxu2  ;;  %1265 = vmatpush.msrb.mxu1 %v1218_v13  ;;  %1240 = vmatpush.msrb.mxu0 %v1201_v14  ;;  %v2911_v13 = vld [vmem:[#allocation4 + $0x24] sm:$0xf0] }
  0xf3   : > { %v3803_v22 = vpop.f32.mrf.mxu1  ;;  %1160 = vmatpush.msra.mxu2 %v1028_v28  ;;  %v1073_v37 = vadd.f32 %v1072_v31, %v1054_v5  ;;  %v1091_v38 = vpop.f32.mrf.mxu3  ;;  %v1104_v62 = vadd.f32 %v1103_v21, %v1085_v59  ;;  %v1199_v28 = vld [vmem:[#allocation2 + $0x10] sm:$0xff]  ;;  %v1198_v21 = vld [vmem:[#allocation2 + $0x8] sm:$0xff]  ;;  %v2550_v31 = vld [vmem:[#allocation4 + $0x60] sm:$0xf]  ;;  %v2535_v59 = vor.u32 %v2915_v47, %v2534_v46 }
  0xf4   : > { %2494 = vmatmul.msk.f32.vlgmr.msra.gmra.mxu2 %vm1135_vm4, %v3808_v23  ;;  %1266 = vmatpush.msrb.mxu1 %v1217_v15  ;;  %v2622_v5 = vld [vmem:[#allocation4 + $0xf0] sm:$0xf]  ;;  %v2566_v46 = vld [vmem:[#allocation4 + $0x80] sm:$0xf]  ;;  %v2923_v47 = vld [vmem:[#allocation4 + $0x84] sm:$0xf0] }
  0xf5   : > { %v1092_v7 = vadd.f32 %v1091_v38, %v1073_v37  ;;  %v1123_v18 = vadd.f32 %v3803_v22, %v1104_v62  ;;  %1241 = vmatpush.msrb.mxu0 %v1200_v16  ;;  %v1214_v22 = vld [vmem:[#allocation2 + $0x88] sm:$0xff]  ;;  %v2614_v38 = vld [vmem:[#allocation4 + $0xe0] sm:$0xf]  ;;  %v2663_v16 = vor.u32 %v2947_v50, %v2662_v11 }
  0xf6   : > { %1267 = vmatpush.msrb.mxu1 %v1216_v17  ;;  %v2615_v40 = vor.u32 %v2935_v39, %v2614_v38  ;;  %v2742_v62 = vld [vmem:[#allocation4 + $0x1e0] sm:$0xf]  ;;  %v2519_v17 = vor.u32 %v2911_v13, %v2518_v55  ;;  %v2798_v38 = vld [vmem:[#allocation4 + $0x250] sm:$0xf]  ;;  %v2981_v39 = vld [vmem:[#allocation4 + $0x254] sm:$0xf0] }
  0xf7   : > { %1242 = vmatpush.msrb.mxu0 %v1199_v28  ;;  %v2582_v28 = vld [vmem:[#allocation4 + $0xa0] sm:$0xf]  ;;  %v2975_v50 = vld [vmem:[#allocation4 + $0x224] sm:$0xf0]  ;;  %v2916_v13 = vld [vmem:[#allocation4 + $0x54] sm:$0xf] }
  0xf8   : > { %1268 = vmatpush.msrb.mxu1 %v1215_v20  ;;  %v2927_v20 = vld [vmem:[#allocation4 + $0xa4] sm:$0xf0]  ;;  %v2774_v11 = vld [vmem:[#allocation4 + $0x220] sm:$0xf] }
  0xf9   : > { %1243 = vmatpush.msrb.mxu0 %v1198_v21  ;;  %v2510_v21 = vld [vmem:[#allocation4 + $0x10] sm:$0xf]  ;;  %v2775_v55 = vor.u32 %v2975_v50, %v2774_v11  ;;  %v2926_v50 = vld [vmem:[#allocation4 + $0xa4] sm:$0xf] }
  0xfa   : > { %v1105_v25 = vpop.f32.mrf.mxu0  ;;  %1269 = vmatpush.msrb.mxu1 %v1214_v22  ;;  %v2909_v22 = vld [vmem:[#allocation4 + $0x14] sm:$0xf0] }
  0xfb   : > { %v1124_v26 = vpop.f32.mrf.mxu1  ;;  %v1106_v32 = vadd.f32 %v1105_v25, %v1087_v54  ;;  %v1213_v25 = vld [vmem:[#allocation2 + $0x80] sm:$0xff]  ;;  %1244 = vmatpush.msrb.mxu0 %v1197_v24  ;;  %v2526_v54 = vld [vmem:[#allocation4 + $0x30] sm:$0xf] }
  0xfc   : > { %2495 = vmatmul.msk.f32.gmra.mxu2 %vm1135_vm4, %v3815_v27  ;;  %1270 = vmatpush.msrb.mxu1 %v1213_v25  ;;  %v2527_v10 = vor.u32 %v2913_v61, %v2526_v54  ;;  %v2511_v25 = vor.u32 %v2909_v22, %v2510_v21  ;;  %v2977_v61 = vld [vmem:[#allocation4 + $0x234] sm:$0xf0]  ;;  %v2766_v22 = vld [vmem:[#allocation4 + $0x210] sm:$0xf] }
  0xfd   : > { %v1125_v8 = vadd.f32 %v1124_v26, %v1106_v32  ;;  %v2931_v32 = vld [vmem:[#allocation4 + $0xc4] sm:$0xf0]  ;;  %v2957_v21 = vld [vmem:[#allocation4 + $0x194] sm:$0xf0] }
  0xfe   : > { %1852 = vmatpush.bf16.msra.mxu1 %v2751_v58  ;;  %v2943_v58 = vld [vmem:[#allocation4 + $0x124] sm:$0xf0] }
 0x102   : > { %v1108_v19 = vpop.f32.mrf.mxu0 }
 0x103   : > { %v1127_v33 = vpop.f32.mrf.mxu1  ;;  %v1109_v56 = vadd.f32 %v1108_v19, %v1090_v49  ;;  %v2559_v19 = vor.u32 %v2921_v30, %v2558_v29  ;;  %v2687_v49 = vor.u32 %v2953_v45, %v2686_v41  ;;  %v2502_v29 = vld [vmem:[#allocation4] sm:$0xf]  ;;  %v2907_v30 = vld [vmem:[#allocation4 + $0x4] sm:$0xf0]  ;;  %v2654_v41 = vld [vmem:[#allocation4 + $0x130] sm:$0xf] }
 0x104   : > { %2496 = vmatmul.msk.f32.gmra.mxu2 %vm1135_vm4, %v3822_v34  ;;  %v2963_v45 = vld [vmem:[#allocation4 + $0x1c4] sm:$0xf0] }
 0x105   : > { %v1128_v1 = vadd.f32 %v1127_v33, %v1109_v56  ;;  %1810 = vmatpush.bf16.msrb.mxu2 %v2559_v19  ;;  %v2551_v33 = vor.u32 %v2919_v4, %v2550_v31  ;;  %v2607_v56 = vor.u32 %v2933_v44, %v2606_v43  ;;  %1838 = vmatpush.bf16.msra.mxu0 %v2687_v49  ;;  %v2814_v31 = vld [vmem:[#allocation4 + $0x270] sm:$0xf]  ;;  %v2985_v19 = vld [vmem:[#allocation4 + $0x274] sm:$0xf0]  ;;  %v2726_v43 = vld [vmem:[#allocation4 + $0x1c0] sm:$0xf] }
 0x106   : > { %v2727_v49 = vor.u32 %v2963_v45, %v2726_v43  ;;  %v2912_v43 = vld [vmem:[#allocation4 + $0x34] sm:$0xf] }
 0x109   : > { %1811 = vmatpush.bf16.msrb.mxu2 %v2551_v33  ;;  %v2815_v33 = vor.u32 %v2985_v19, %v2814_v31  ;;  %v2536_v31 = vld [vmem:[#allocation4 + $0x48] sm:$0xf0] }
 0x10a   : > { %v1110_v51 = vpop.f32.mrf.mxu0 }
 0x10b   : > { %v1111_v57 = vadd.f32 %v1110_v51, %v1092_v7  ;;  %v1129_v2 = vpop.f32.mrf.mxu1  ;;  %v2678_v7 = vld [vmem:[#allocation4 + $0x160] sm:$0xf]  ;;  %v2951_v51 = vld [vmem:[#allocation4 + $0x164] sm:$0xf0] }
 0x10d   : > { %v1130_v48 = vadd.f32 %v1129_v2, %v1111_v57  ;;  %v2598_v57 = vld [vmem:[#allocation4 + $0xc0] sm:$0xf]  ;;  %v2679_v2 = vor.u32 %v2951_v51, %v2678_v7  ;;  %1812 = vmatpush.bf16.msrb.mxu2 %v2543_v42  ;;  %v2945_v42 = vld [vmem:[#allocation4 + $0x134] sm:$0xf0]  ;;  %v2567_v7 = vor.u32 %v2923_v47, %v2566_v46  ;;  %v2932_v46 = vld [vmem:[#allocation4 + $0xd4] sm:$0xf] }
 0x10e   : > { %v2599_v6 = vor.u32 %v2931_v32, %v2598_v57  ;;  %v2655_v44 = vor.u32 %v2945_v42, %v2654_v41  ;;  %v2790_v51 = vld [vmem:[#allocation4 + $0x240] sm:$0xf]  ;;  %v2608_v47 = vld [vmem:[#allocation4 + $0xd8] sm:$0xf0] }
 0x10f   : > { %1183 = vmatpush.msra.mxu3 %v1130_v48  ;;  %v2670_v48 = vld [vmem:[#allocation4 + $0x150] sm:$0xf]  ;;  %1839 = vmatpush.bf16.msra.mxu0 %v2679_v2  ;;  %v2791_v54 = vor.u32 %v2979_v52, %v2790_v51  ;;  %v2646_v2 = vld [vmem:[#allocation4 + $0x120] sm:$0xf]  ;;  %v2680_v51 = vld [vmem:[#allocation4 + $0x168] sm:$0xf0] }
 0x110   : > { %v2671_v0 = vor.u32 %v2949_v60, %v2670_v48  ;;  %v2647_v32 = vor.u32 %v2943_v58, %v2646_v2  ;;  %v2961_v48 = vld [vmem:[#allocation4 + $0x1b4] sm:$0xf0]  ;;  %v2782_v60 = vld [vmem:[#allocation4 + $0x230] sm:$0xf]  ;;  %v2910_v52 = vld [vmem:[#allocation4 + $0x24] sm:$0xf] }
 0x111   : > { %1184 = vmatpush.msra.mxu3 %v1128_v1  ;;  %v2967_v1 = vld [vmem:[#allocation4 + $0x1e4] sm:$0xf0]  ;;  %1813 = vmatpush.bf16.msrb.mxu2 %v2535_v59  ;;  %v2718_v59 = vld [vmem:[#allocation4 + $0x1b0] sm:$0xf]  ;;  %v2600_v2 = vld [vmem:[#allocation4 + $0xc8] sm:$0xf0] }
 0x112   : > { %v2743_v3 = vor.u32 %v2967_v1, %v2742_v62  ;;  %v2719_v62 = vor.u32 %v2961_v48, %v2718_v59  ;;  %v2783_v1 = vor.u32 %v2977_v61, %v2782_v60  ;;  %v2948_v58 = vld [vmem:[#allocation4 + $0x154] sm:$0xf]  ;;  %v2512_v60 = vld [vmem:[#allocation4 + $0x18] sm:$0xf0] }
 0x113   : > { %1185 = vmatpush.msra.mxu3 %v1125_v8  ;;  %v2590_v8 = vld [vmem:[#allocation4 + $0xb0] sm:$0xf]  ;;  %1840 = vmatpush.bf16.msra.mxu0 %v2671_v0  ;;  %v2941_v0 = vld [vmem:[#allocation4 + $0x114] sm:$0xf0]  ;;  %v2908_v48 = vld [vmem:[#allocation4 + $0x14] sm:$0xf] }
 0x114   : > { %1853 = vmatpush.bf16.msra.mxu1 %v2743_v3  ;;  %v2591_v15 = vor.u32 %v2929_v63, %v2590_v8  ;;  %v2918_v3 = vld [vmem:[#allocation4 + $0x64] sm:$0xf]  ;;  %v2638_v63 = vld [vmem:[#allocation4 + $0x110] sm:$0xf] }
 0x115   : > { %1186 = vmatpush.msra.mxu3 %v1123_v18  ;;  %v2734_v18 = vld [vmem:[#allocation4 + $0x1d0] sm:$0xf]  ;;  %1814 = vmatpush.bf16.msrb.mxu2 %v2527_v10  ;;  %v2959_v10 = vld [vmem:[#allocation4 + $0x1a4] sm:$0xf0] }
 0x116   : > { %2497 = vmatmul.msk.f32.vlgmr.msra.gmra.mxu3 %vm1135_vm4, %v3808_v23  ;;  %v2735_v14 = vor.u32 %v2965_v12, %v2734_v18  ;;  %v2710_v18 = vld [vmem:[#allocation4 + $0x1a0] sm:$0xf] }
 0x117   : > { %1841 = vmatpush.bf16.msra.mxu0 %v2663_v16  ;;  %v2711_v12 = vor.u32 %v2959_v10, %v2710_v18  ;;  %v2630_v16 = vld [vmem:[#allocation4 + $0x100] sm:$0xf]  ;;  %v2906_v18 = vld [vmem:[#allocation4 + $0x4] sm:$0xf] }
 0x118   : > { %1854 = vmatpush.bf16.msra.mxu1 %v2735_v14  ;;  %v2544_v14 = vld [vmem:[#allocation4 + $0x58] sm:$0xf0] }
 0x119   : > { %1815 = vmatpush.bf16.msrb.mxu2 %v2519_v17  ;;  %v2939_v17 = vld [vmem:[#allocation4 + $0x104] sm:$0xf0] }
 0x11b   : > { %1842 = vmatpush.bf16.msra.mxu0 %v2655_v44  ;;  %v2528_v44 = vld [vmem:[#allocation4 + $0x38] sm:$0xf0] }
 0x11c   : > { %1855 = vmatpush.bf16.msra.mxu1 %v2727_v49  ;;  %v2531_v45 = vor.u32 %v2912_v43, %v2528_v44  ;;  %v2950_v49 = vld [vmem:[#allocation4 + $0x164] sm:$0xf] }
 0x11d   : > { %1816 = vmatpush.bf16.msrb.mxu2 %v2511_v25 }
 0x11e   : > { %2498 = vmatmul.msk.f32.gmra.mxu3 %vm1135_vm4, %v3815_v27 }
 0x11f   : > { %1843 = vmatpush.bf16.msra.mxu0 %v2647_v32  ;;  %v2672_v32 = vld [vmem:[#allocation4 + $0x158] sm:$0xf0] }
 0x120   : > { %1856 = vmatpush.bf16.msra.mxu1 %v2719_v62  ;;  %v2675_v61 = vor.u32 %v2948_v58, %v2672_v32  ;;  %v2515_v62 = vor.u32 %v2908_v48, %v2512_v60  ;;  %v2728_v48 = vld [vmem:[#allocation4 + $0x1c8] sm:$0xf0]  ;;  %v2984_v60 = vld [vmem:[#allocation4 + $0x274] sm:$0xf] }
 0x124   : > { %1857 = vmatpush.bf16.msra.mxu1 %v2711_v12  ;;  %v2584_v12 = vld [vmem:[#allocation4 + $0xa8] sm:$0xf0] }
 0x126   : > { %2499 = vmatmul.msk.f32.gmra.mxu3 %vm1135_vm4, %v3822_v34  ;;  %v2937_v34 = vld [vmem:[#allocation4 + $0xf4] sm:$0xf0] }
 0x127   : > { %v2623_v37 = vor.u32 %v2937_v34, %v2622_v5  ;;  %v2503_v5 = vor.u32 %v2907_v30, %v2502_v29  ;;  %v2983_v34 = vld [vmem:[#allocation4 + $0x264] sm:$0xf0]  ;;  %v2914_v29 = vld [vmem:[#allocation4 + $0x44] sm:$0xf] }
 0x128   : > { %v2539_v19 = vor.u32 %v2914_v29, %v2536_v31  ;;  %v2940_v29 = vld [vmem:[#allocation4 + $0x114] sm:$0xf] }
 0x129   : > { %1824 = vmatpush.bf16.msrb.mxu3 %v2623_v37  ;;  %1817 = vmatpush.bf16.msrb.mxu2 %v2503_v5  ;;  %v2807_v37 = vor.u32 %v2983_v34, %v2806_v35  ;;  %v2955_v5 = vld [vmem:[#allocation4 + $0x184] sm:$0xf0]  ;;  %v2758_v35 = vld [vmem:[#allocation4 + $0x200] sm:$0xf] }
 0x12a   : > { %v2971_v34 = vld [vmem:[#allocation4 + $0x204] sm:$0xf0] }
 0x12d   : > { %1825 = vmatpush.bf16.msrb.mxu3 %v2615_v40  ;;  %1866 = vmatpush.bf16.msra.mxu2 %v2815_v33  ;;  %v2799_v40 = vor.u32 %v2981_v39, %v2798_v38  ;;  %v2616_v38 = vld [vmem:[#allocation4 + $0xe8] sm:$0xf0]  ;;  %v2952_v39 = vld [vmem:[#allocation4 + $0x174] sm:$0xf] }
 0x131   : > { %1826 = vmatpush.bf16.msrb.mxu3 %v2607_v56  ;;  %1867 = vmatpush.bf16.msra.mxu2 %v2807_v37  ;;  %v2560_v56 = vld [vmem:[#allocation4 + $0x78] sm:$0xf0]  ;;  %v2759_v37 = vor.u32 %v2971_v34, %v2758_v35  ;;  %v2968_v35 = vld [vmem:[#allocation4 + $0x1f4] sm:$0xf] }
 0x132   : > { %v2563_v57 = vor.u32 %v2920_v53, %v2560_v56  ;;  %v2520_v53 = vld [vmem:[#allocation4 + $0x28] sm:$0xf0] }
 0x133   : > { %v2523_v56 = vor.u32 %v2910_v52, %v2520_v53  ;;  %v2964_v53 = vld [vmem:[#allocation4 + $0x1d4] sm:$0xf] }
 0x135   : > { %1827 = vmatpush.bf16.msrb.mxu3 %v2599_v6  ;;  %1868 = vmatpush.bf16.msra.mxu2 %v2799_v40  ;;  %v2552_v6 = vld [vmem:[#allocation4 + $0x68] sm:$0xf0]  ;;  %v2688_v40 = vld [vmem:[#allocation4 + $0x178] sm:$0xf0] }
 0x136   : > { %v2555_v8 = vor.u32 %v2918_v3, %v2552_v6  ;;  %v2691_v42 = vor.u32 %v2952_v39, %v2688_v40  ;;  %v2928_v3 = vld [vmem:[#allocation4 + $0xb4] sm:$0xf]  ;;  %v2592_v6 = vld [vmem:[#allocation4 + $0xb8] sm:$0xf0] }
 0x139   : > { %1828 = vmatpush.bf16.msrb.mxu3 %v2591_v15  ;;  %1869 = vmatpush.bf16.msra.mxu2 %v2791_v54  ;;  %v2547_v15 = vor.u32 %v2916_v13, %v2544_v14  ;;  %v2683_v54 = vor.u32 %v2950_v49, %v2680_v51  ;;  %v2587_v14 = vor.u32 %v2926_v50, %v2584_v12 }
 0x13d   : > { %1870 = vmatpush.bf16.msra.mxu2 %v2783_v1 }
 0x141   : > { %1871 = vmatpush.bf16.msra.mxu2 %v2775_v55  ;;  %v2944_v55 = vld [vmem:[#allocation4 + $0x134] sm:$0xf] }
 0x177   : > { %v1162_v23 = vpop.f32.mrf.mxu2 }
 0x178   : > { %1245 = vmatmul.f32.vlgmr.msrb.gmra.mxu0 %v1162_v23  ;;  %v2583_v23 = vor.u32 %v2927_v20, %v2582_v28  ;;  %v2702_v28 = vld [vmem:[#allocation4 + $0x190] sm:$0xf]  ;;  %v2631_v20 = vor.u32 %v2939_v17, %v2630_v16  ;;  %v2924_v17 = vld [vmem:[#allocation4 + $0x94] sm:$0xf] }
 0x17a   : > { %1829 = vmatpush.bf16.msrb.mxu3 %v2583_v23  ;;  %v2973_v23 = vld [vmem:[#allocation4 + $0x214] sm:$0xf0] }
 0x17b   : > { %v2767_v25 = vor.u32 %v2973_v23, %v2766_v22  ;;  %v2648_v23 = vld [vmem:[#allocation4 + $0x128] sm:$0xf0] }
 0x17d   : > { %1872 = vmatpush.bf16.msra.mxu2 %v2767_v25 }
 0x17f   : > { %v1165_v26 = vpop.f32.mrf.mxu2 }
 0x180   : > { %1248 = vmatmul.f32.gmra.mxu0 %v1165_v26  ;;  %v2574_v26 = vld [vmem:[#allocation4 + $0x90] sm:$0xf] }
 0x181   : > { %1873 = vmatpush.bf16.msra.mxu2 %v2759_v37  ;;  %v2938_v37 = vld [vmem:[#allocation4 + $0x104] sm:$0xf] }
 0x187   : > { %v1168_v27 = vpop.f32.mrf.mxu2 }
 0x188   : > { %1251 = vmatmul.f32.gmra.mxu0 %v1168_v27  ;;  %v2925_v27 = vld [vmem:[#allocation4 + $0x94] sm:$0xf0] }
 0x189   : > { %v2575_v4 = vor.u32 %v2925_v27, %v2574_v26  ;;  %v2936_v26 = vld [vmem:[#allocation4 + $0xf4] sm:$0xf]  ;;  %v2624_v27 = vld [vmem:[#allocation4 + $0xf8] sm:$0xf0] }
 0x18a   : > { %v2627_v30 = vor.u32 %v2936_v26, %v2624_v27  ;;  %v2922_v26 = vld [vmem:[#allocation4 + $0x84] sm:$0xf]  ;;  %v2568_v27 = vld [vmem:[#allocation4 + $0x88] sm:$0xf0] }
 0x18b   : > { %1830 = vmatpush.bf16.msrb.mxu3 %v2575_v4  ;;  %v2694_v4 = vld [vmem:[#allocation4 + $0x180] sm:$0xf]  ;;  %v2571_v31 = vor.u32 %v2922_v26, %v2568_v27  ;;  %v2712_v26 = vld [vmem:[#allocation4 + $0x1a8] sm:$0xf0] }
 0x18c   : > { %v2695_v33 = vor.u32 %v2955_v5, %v2694_v4 }
 0x18f   : > { %1831 = vmatpush.bf16.msrb.mxu3 %v2567_v7  ;;  %v2611_v7 = vor.u32 %v2932_v46, %v2608_v47  ;;  %v2744_v46 = vld [vmem:[#allocation4 + $0x1e8] sm:$0xf0] }
 0x193   : > { %1880 = vmatpush.bf16.msra.mxu3 %v2563_v57  ;;  %v2930_v57 = vld [vmem:[#allocation4 + $0xc4] sm:$0xf] }
 0x194   : > { %v2603_v59 = vor.u32 %v2930_v57, %v2600_v2 }
 0x197   : > { %1881 = vmatpush.bf16.msra.mxu3 %v2555_v8  ;;  %v2946_v8 = vld [vmem:[#allocation4 + $0x144] sm:$0xf] }
 0x199   : > { %v1188_v9 = vpop.f32.mrf.mxu3 }
 0x19a   : > { %1271 = vmatmul.f32.vlgmr.msrb.gmra.mxu1 %v1188_v9  ;;  %v2639_v9 = vor.u32 %v2941_v0, %v2638_v63  ;;  %v2595_v63 = vor.u32 %v2928_v3, %v2592_v6  ;;  %v2664_v0 = vld [vmem:[#allocation4 + $0x148] sm:$0xf0] }
 0x19b   : > { %1882 = vmatpush.bf16.msra.mxu3 %v2547_v15  ;;  %v2667_v10 = vor.u32 %v2946_v8, %v2664_v0  ;;  %v2656_v15 = vld [vmem:[#allocation4 + $0x138] sm:$0xf0] }
 0x19c   : > { %1844 = vmatpush.bf16.msra.mxu0 %v2639_v9  ;;  %v2504_v9 = vld [vmem:[#allocation4 + $0x8] sm:$0xf0]  ;;  %v2659_v16 = vor.u32 %v2944_v55, %v2656_v15  ;;  %v2982_v15 = vld [vmem:[#allocation4 + $0x264] sm:$0xf] }
 0x19d   : > { %v2507_v11 = vor.u32 %v2906_v18, %v2504_v9 }
 0x19f   : > { %1883 = vmatpush.bf16.msra.mxu3 %v2539_v19  ;;  %v2640_v19 = vld [vmem:[#allocation4 + $0x118] sm:$0xf0] }
 0x1a0   : > { %1845 = vmatpush.bf16.msra.mxu0 %v2631_v20  ;;  %v2942_v20 = vld [vmem:[#allocation4 + $0x124] sm:$0xf] }
 0x1a1   : > { %v1191_v24 = vpop.f32.mrf.mxu3  ;;  %v2651_v25 = vor.u32 %v2942_v20, %v2648_v23 }
 0x1a2   : > { %1274 = vmatmul.f32.gmra.mxu1 %v1191_v24  ;;  %v2703_v24 = vor.u32 %v2957_v21, %v2702_v28  ;;  %v2576_v28 = vld [vmem:[#allocation4 + $0x98] sm:$0xf0] }
 0x1a3   : > { %1884 = vmatpush.bf16.msra.mxu3 %v2531_v45  ;;  %v2579_v22 = vor.u32 %v2924_v17, %v2576_v28  ;;  %v2966_v45 = vld [vmem:[#allocation4 + $0x1e4] sm:$0xf] }
 0x1a4   : > { %1858 = vmatpush.bf16.msra.mxu1 %v2703_v24  ;;  %1894 = vmatpush.bf16.msrb.mxu0 %v2627_v30 }
 0x1a7   : > { %1885 = vmatpush.bf16.msra.mxu3 %v2523_v56 }
 0x1a8   : > { %1859 = vmatpush.bf16.msra.mxu1 %v2695_v33  ;;  %v2643_v33 = vor.u32 %v2940_v29, %v2640_v19  ;;  %v2980_v29 = vld [vmem:[#allocation4 + $0x254] sm:$0xf] }
 0x1a9   : > { %v1194_v36 = vpop.f32.mrf.mxu3 }
 0x1aa   : > { %1277 = vmatmul.f32.gmra.mxu1 %v1194_v36  ;;  %v2934_v36 = vld [vmem:[#allocation4 + $0xe4] sm:$0xf] }
 0x1ab   : > { %v2619_v41 = vor.u32 %v2934_v36, %v2616_v38  ;;  %1886 = vmatpush.bf16.msra.mxu3 %v2515_v62  ;;  %v2752_v36 = vld [vmem:[#allocation4 + $0x1f8] sm:$0xf0]  ;;  %v2632_v38 = vld [vmem:[#allocation4 + $0x108] sm:$0xf0] }
 0x1ac   : > { %1908 = vmatpush.bf16.msrb.mxu1 %v2691_v42  ;;  %v2635_v39 = vor.u32 %v2938_v37, %v2632_v38  ;;  %v2755_v43 = vor.u32 %v2968_v35, %v2752_v36  ;;  %v2792_v35 = vld [vmem:[#allocation4 + $0x248] sm:$0xf0]  ;;  %v2954_v37 = vld [vmem:[#allocation4 + $0x184] sm:$0xf] }
 0x1ad   : > { %1895 = vmatpush.bf16.msrb.mxu0 %v2619_v41  ;;  %v2696_v38 = vld [vmem:[#allocation4 + $0x188] sm:$0xf0] }
 0x1af   : > { %1887 = vmatpush.bf16.msra.mxu3 %v2507_v11 }
 0x1b0   : > { %1909 = vmatpush.bf16.msrb.mxu1 %v2683_v54  ;;  %v2736_v54 = vld [vmem:[#allocation4 + $0x1d8] sm:$0xf0] }
 0x1b1   : > { %1896 = vmatpush.bf16.msrb.mxu0 %v2611_v7  ;;  %v2747_v7 = vor.u32 %v2966_v45, %v2744_v46  ;;  %v2739_v2 = vor.u32 %v2964_v53, %v2736_v54  ;;  %v2776_v45 = vld [vmem:[#allocation4 + $0x228] sm:$0xf0] }
 0x1b4   : > { %1910 = vmatpush.bf16.msrb.mxu1 %v2675_v61  ;;  %v2816_v61 = vld [vmem:[#allocation4 + $0x278] sm:$0xf0] }
 0x1b5   : > { %1897 = vmatpush.bf16.msrb.mxu0 %v2603_v59  ;;  %v2962_v59 = vld [vmem:[#allocation4 + $0x1c4] sm:$0xf]  ;;  %v2819_v9 = vor.u32 %v2984_v60, %v2816_v61 }
 0x1b6   : > { %v2731_v18 = vor.u32 %v2962_v59, %v2728_v48 }
 0x1b8   : > { %1911 = vmatpush.bf16.msrb.mxu1 %v2667_v10  ;;  %v2960_v10 = vld [vmem:[#allocation4 + $0x1b4] sm:$0xf] }
 0x1b9   : > { %1898 = vmatpush.bf16.msrb.mxu0 %v2595_v63 }
 0x1bc   : > { %1912 = vmatpush.bf16.msrb.mxu1 %v2659_v16  ;;  %v2808_v16 = vld [vmem:[#allocation4 + $0x268] sm:$0xf0] }
 0x1bd   : > { %1899 = vmatpush.bf16.msrb.mxu0 %v2587_v14 }
 0x1c0   : > { %1913 = vmatpush.bf16.msrb.mxu1 %v2651_v25  ;;  %v2958_v25 = vld [vmem:[#allocation4 + $0x1a4] sm:$0xf] }
 0x1c1   : > { %1900 = vmatpush.bf16.msrb.mxu0 %v2579_v22 }
 0x1c4   : > { %1914 = vmatpush.bf16.msrb.mxu1 %v2643_v33  ;;  %v2978_v33 = vld [vmem:[#allocation4 + $0x244] sm:$0xf] }
 0x1c5   : > { %1901 = vmatpush.bf16.msrb.mxu0 %v2571_v31  ;;  %v2715_v31 = vor.u32 %v2958_v25, %v2712_v26  ;;  %v2795_v36 = vor.u32 %v2978_v33, %v2792_v35  ;;  %v2021_v25 = vld [vmem:[#allocation6 + $0xd0] sm:$0xff]  ;;  %v2002_v35 = vld [vmem:[#allocation6 + $0x38] sm:$0xff] }
 0x1c8   : > { %1915 = vmatpush.bf16.msrb.mxu1 %v2635_v39  ;;  %v2976_v39 = vld [vmem:[#allocation4 + $0x234] sm:$0xf] }
 0x1f5   : > { %v1246_v1 = vpop.f32.mrf.mxu0 }
 0x1fd   : > { %v1249_v21 = vpop.f32.mrf.mxu0 }
 0x205   : > { %v1252_v42 = vpop.f32.mrf.mxu0 }
 0x217   : > { %v1272_v13 = vpop.f32.mrf.mxu1 }
 0x218   : > { %v1273_v24 = vadd.f32 %v1272_v13, %v1246_v1  ;;  %v2720_v13 = vld [vmem:[#allocation4 + $0x1b8] sm:$0xf0] }
 0x219   : > { %v2723_v22 = vor.u32 %v2960_v10, %v2720_v13  ;;  %v2010_v10 = vld [vmem:[#allocation6 + $0x78] sm:$0xff] }
 0x21a   : > { %v1281_v4 = vpack.c.bf16 %v1273_v24, %v1273_v24  ;;  %v2811_v24 = vor.u32 %v2982_v15, %v2808_v16  ;;  %v3856_v16 = vld [vmem:[%s3877_s7] sm:$0xff] }
 0x21c   : > { %v1286_v40 = vunpack.c.l.b16 %v1281_v4  ;;  %v2956_v4 = vld [vmem:[#allocation4 + $0x194] sm:$0xf] }
 0x21f   : > { %v1275_v30 = vpop.f32.mrf.mxu1 }
 0x220   : > { %v1276_v5 = vadd.f32 %v1275_v30, %v1249_v21  ;;  %v2800_v30 = vld [vmem:[#allocation4 + $0x258] sm:$0xf0] }
 0x221   : > { %v2803_v19 = vor.u32 %v2980_v29, %v2800_v30  ;;  %v2004_v29 = vld [vmem:[#allocation6 + $0x48] sm:$0xff] }
 0x222   : > { %v1282_v34 = vpack.c.bf16 %v1276_v5, %v1276_v5  ;;  %v2704_v5 = vld [vmem:[#allocation4 + $0x198] sm:$0xf0] }
 0x224   : > { %v1287_v41 = vunpack.c.l.b16 %v1282_v34  ;;  %v2707_v34 = vor.u32 %v2956_v4, %v2704_v5  ;;  %v2019_v5 = vld [vmem:[#allocation6 + $0xc0] sm:$0xff] }
 0x226   : > { %v3835_v44 = vpack.c.b16 %v1287_v41, %v1286_v40  ;;  %v2784_v40 = vld [vmem:[#allocation4 + $0x238] sm:$0xf0]  ;;  %v2699_v41 = vor.u32 %v2954_v37, %v2696_v38  ;;  %v2001_v38 = vld [vmem:[#allocation6 + $0x30] sm:$0xff] }
 0x227   : > { %v1278_v47 = vpop.f32.mrf.mxu1 }
 0x228   : > { %v1279_v49 = vadd.f32 %v1278_v47, %v1252_v42  ;;  %1818 = vmatmul.bf16.vlgmr.msrb.gmra.mxu2 %v3835_v44  ;;  %v1296_v51 = vshll.u32 %v3835_v44, 16  ;;  %v1294_v56 = vshrl.u32 %v3835_v44, 16  ;;  %v1306_v62 = vrot.slane %v3835_v44, 1  ;;  %v2972_v47 = vld [vmem:[#allocation4 + $0x214] sm:$0xf] }
 0x229   : > { %1922 = vmatpush.bf16.msrb.mxu2 %v2755_v43  ;;  %v1320_v21 = vrot.slane %v3835_v44, 2  ;;  %v2787_v42 = vor.u32 %v2976_v39, %v2784_v40  ;;  %v2974_v43 = vld [vmem:[#allocation4 + $0x224] sm:$0xf]  ;;  %v2017_v40 = vld [vmem:[#allocation6 + $0xb0] sm:$0xff] }
 0x22a   : > { %v1283_v52 = vpack.c.bf16 %v1279_v49, %v1279_v49  ;;  %v1298_v58 = vrot.slane %v1296_v51, 1  ;;  %v1310_v1 = vrot.slane %v1294_v56, 1  ;;  %v1311_v63 = vrot.slane %v1296_v51, 2  ;;  %v2768_v49 = vld [vmem:[#allocation4 + $0x218] sm:$0xf0] }
 0x22b   : > { %v2779_v46 = vor.u32 %v2974_v43, %v2776_v45  ;;  %v2970_v51 = vld [vmem:[#allocation4 + $0x204] sm:$0xf]  ;;  %v2016_v45 = vld [vmem:[#allocation6 + $0xa8] sm:$0xff] }
 0x22c   : > { %v1291_v57 = vunpack.c.l.b16 %v1283_v52  ;;  %v1299_v0 = vor.u32 %v1298_v58, %v1294_v56  ;;  %v1312_v28 = vor.u32 %v1311_v63, %v1310_v1  ;;  %v2760_v52 = vld [vmem:[#allocation4 + $0x208] sm:$0xf0] }
 0x22d   : > { %1923 = vmatpush.bf16.msrb.mxu2 %v2747_v7  ;;  %v2771_v7 = vor.u32 %v2972_v47, %v2768_v49  ;;  %v2763_v53 = vor.u32 %v2970_v51, %v2760_v52  ;;  %v1999_v47 = vld [vmem:[#allocation6 + $0x20] sm:$0xff]  ;;  %v1998_v51 = vld [vmem:[#allocation6 + $0x18] sm:$0xff] }
 0x22e   : > { %v1292_v32 = vpack.c.b16 %v1291_v57, %v1291_v57 }
 0x230   : > { %v1313_v3 = vshrl.u32 %v1292_v32, 16  ;;  %v1307_v6 = vrot.slane %v1292_v32, 1  ;;  %v1301_v8 = vshll.u32 %v1292_v32, 16  ;;  %v1321_v14 = vrot.slane %v1292_v32, 2 }
 0x231   : > { %1924 = vmatpush.bf16.msrb.mxu2 %v2739_v2 }
 0x232   : > { %v1308_v11 = vsel %vm424_vm1, %v1306_v62, %v1307_v6  ;;  %v1303_v50 = vrot.slane %v1301_v8, 1  ;;  %v1315_v12 = vrot.slane %v1313_v3, 1  ;;  %v1316_v55 = vrot.slane %v1301_v8, 2 }
 0x233   : > { %1846 = vmatmul.bf16.vlgmr.msra.gmra.mxu0 %v1308_v11  ;;  %v1322_v27 = vsel %vm448_vm3, %v1320_v21, %v1321_v14  ;;  %v2008_v14 = vld [vmem:[#allocation6 + $0x68] sm:$0xff] }
 0x234   : > { %v1304_v17 = vsel %vm401_vm0, %v1299_v0, %v1303_v50  ;;  %v1317_v20 = vor.u32 %v1316_v55, %v1315_v12  ;;  %v2009_v50 = vld [vmem:[#allocation6 + $0x70] sm:$0xff] }
 0x235   : > { %1832 = vmatmul.bf16.vlgmr.msrb.gmra.mxu3 %v1304_v17  ;;  %1925 = vmatpush.bf16.msrb.mxu2 %v2731_v18  ;;  %v2025_v55 = vld [vmem:[#allocation6 + $0xf0] sm:$0xff] }
 0x236   : > { %1936 = vmatpush.bf16.msrb.mxu3 %v2819_v9  ;;  %v1318_v23 = vsel %vm432_vm2, %v1312_v28, %v1317_v20  ;;  %v2007_v28 = vld [vmem:[#allocation6 + $0x60] sm:$0xff] }
 0x237   : > { %1860 = vmatmul.bf16.vlgmr.msra.gmra.mxu1 %v1318_v23  ;;  %v2023_v20 = vld [vmem:[#allocation6 + $0xe0] sm:$0xff] }
 0x238   : > { %1874 = vmatmul.bf16.vlgmr.msra.gmra.mxu2 %v1322_v27 }
 0x239   : > { %1926 = vmatpush.bf16.msrb.mxu2 %v2723_v22  ;;  %v2006_v22 = vld [vmem:[#allocation6 + $0x58] sm:$0xff] }
 0x23a   : > { %1937 = vmatpush.bf16.msrb.mxu3 %v2811_v24  ;;  %v2005_v24 = vld [vmem:[#allocation6 + $0x50] sm:$0xff] }
 0x23d   : > { %1927 = vmatpush.bf16.msrb.mxu2 %v2715_v31  ;;  %v2020_v31 = vld [vmem:[#allocation6 + $0xc8] sm:$0xff] }
 0x23e   : > { %1938 = vmatpush.bf16.msrb.mxu3 %v2803_v19  ;;  %v2003_v19 = vld [vmem:[#allocation6 + $0x40] sm:$0xff] }
 0x241   : > { %1928 = vmatpush.bf16.msrb.mxu2 %v2707_v34 }
 0x242   : > { %1939 = vmatpush.bf16.msrb.mxu3 %v2795_v36  ;;  %v2018_v36 = vld [vmem:[#allocation6 + $0xb8] sm:$0xff] }
 0x243   : > { %1902 = vmatmul.bf16.vlgmr.msrb.gmra.mxu0 %v1304_v17  ;;  %v2024_v17 = vld [vmem:[#allocation6 + $0xe8] sm:$0xff] }
 0x245   : > { %1888 = vmatmul.bf16.vlgmr.msra.gmra.mxu3 %v3835_v44  ;;  %1929 = vmatpush.bf16.msrb.mxu2 %v2699_v41  ;;  %v3850_v44 = vld [vmem:[%s3876_s6] sm:$0x3] }
 0x246   : > { %1940 = vmatpush.bf16.msrb.mxu3 %v2787_v42  ;;  %v1406_v57 = vperm.slane %v3850_v44, 0  ;;  %v1407_v30 = vperm.slane %v3850_v44, 1  ;;  %v2000_v42 = vld [vmem:[#allocation6 + $0x28] sm:$0xff] }
 0x247   : > { %1916 = vmatmul.bf16.vlgmr.msrb.gmra.mxu1 %v1308_v11  ;;  %v2026_v11 = vld [vmem:[#allocation6 + $0xf8] sm:$0xff] }
 0x248   : > { %1930 = vmatmul.bf16.vlgmr.msrb.gmra.mxu2 %v1318_v23  ;;  %v2022_v23 = vld [vmem:[#allocation6 + $0xd8] sm:$0xff] }
 0x249   : > { %2027 = vmatpush.msra.mxu2 %v2010_v10 }
 0x24a   : > { %1941 = vmatpush.bf16.msrb.mxu3 %v2779_v46 }
 0x24b   : > { %2028 = vmatpush.msra.mxu2 %v2009_v50 }
 0x24d   : > { %2029 = vmatpush.msra.mxu2 %v2008_v14 }
 0x24e   : > { %1942 = vmatpush.bf16.msrb.mxu3 %v2771_v7  ;;  %v2015_v7 = vld [vmem:[#allocation6 + $0xa0] sm:$0xff] }
 0x24f   : > { %2030 = vmatpush.msra.mxu2 %v2007_v28 }
 0x251   : > { %2031 = vmatpush.msra.mxu2 %v2006_v22 }
 0x252   : > { %1943 = vmatpush.bf16.msrb.mxu3 %v2763_v53  ;;  %v2014_v53 = vld [vmem:[#allocation6 + $0x98] sm:$0xff] }
 0x253   : > { %2032 = vmatpush.msra.mxu2 %v2005_v24 }
 0x255   : > { %1944 = vmatmul.bf16.vlgmr.msrb.gmra.mxu3 %v1322_v27  ;;  %2033 = vmatpush.msra.mxu2 %v2004_v29 }
 0x256   : > { %2047 = vmatpush.msra.mxu3 %v2026_v11 }
 0x257   : > { %2034 = vmatpush.msra.mxu2 %v2003_v19 }
 0x258   : > { %2048 = vmatpush.msra.mxu3 %v2025_v55 }
 0x259   : > { %2035 = vmatpush.msra.mxu2 %v2002_v35 }
 0x25a   : > { %2049 = vmatpush.msra.mxu3 %v2024_v17 }
 0x25b   : > { %2036 = vmatpush.msra.mxu2 %v2001_v38 }
 0x25c   : > { %2050 = vmatpush.msra.mxu3 %v2023_v20 }
 0x25d   : > { %2037 = vmatpush.msra.mxu2 %v2000_v42 }
 0x25e   : > { %2051 = vmatpush.msra.mxu3 %v2022_v23 }
 0x25f   : > { %2038 = vmatpush.msra.mxu2 %v1999_v47 }
 0x260   : > { %2052 = vmatpush.msra.mxu3 %v2021_v25 }
 0x261   : > { %2039 = vmatpush.msra.mxu2 %v1998_v51 }
 0x262   : > { %2053 = vmatpush.msra.mxu3 %v2020_v31 }
 0x264   : > { %2054 = vmatpush.msra.mxu3 %v2019_v5 }
 0x266   : > { %2055 = vmatpush.msra.mxu3 %v2018_v36 }
 0x268   : > { %2056 = vmatpush.msra.mxu3 %v2017_v40 }
 0x26a   : > { %2057 = vmatpush.msra.mxu3 %v2016_v45 }
 0x26c   : > { %2058 = vmatpush.msra.mxu3 %v2015_v7 }
 0x26e   : > { %2059 = vmatpush.msra.mxu3 %v2014_v53 }
 0x2ab   : > { %v1819_v54 = vpop.f32.mrf.mxu2 }
 0x2ac   : > { %v1820_v32 = vadd.f32 %v1819_v54, %v1406_v57 }
 0x2b0   : > { %v1847_v2 = vpop.f32.mrf.mxu0 }
 0x2b3   : > { %v1821_v56 = vpop.f32.mrf.mxu2 }
 0x2b4   : > { %v1861_v59 = vpop.f32.mrf.mxu1  ;;  %v1822_v61 = vadd.f32 %v1821_v56, %v1406_v57  ;;  %v1997_v56 = vld [vmem:[#allocation6 + $0x10] sm:$0xff] }
 0x2b5   : > { %v2013_v57 = vld [vmem:[#allocation6 + $0x90] sm:$0xff]  ;;  %2040 = vmatpush.msra.mxu2 %v1997_v56 }
 0x2b6   : > { %2060 = vmatpush.msra.mxu3 %v2013_v57 }
 0x2b8   : > { %v1833_v58 = vpop.f32.mrf.mxu3  ;;  %v1849_v6 = vpop.f32.mrf.mxu0 }
 0x2b9   : > { %v1834_v60 = vadd.f32 %v1833_v58, %v1820_v32  ;;  %v1996_v58 = vld [vmem:[#allocation6 + $0x8] sm:$0xff] }
 0x2ba   : > { %2041 = vmatpush.msra.mxu2 %v1996_v58 }
 0x2bb   : > { %v1875_v48 = vpop.f32.mrf.mxu2  ;;  %v1848_v1 = vadd.f32 %v1847_v2, %v1834_v60 }
 0x2bc   : > { %v1863_v63 = vpop.f32.mrf.mxu1 }
 0x2bd   : > { %v1862_v0 = vadd.f32 %v1861_v59, %v1848_v1 }
 0x2bf   : > { %v1876_v15 = vadd.f32 %v1875_v48, %v1862_v0  ;;  %v2012_v48 = vld [vmem:[#allocation6 + $0x88] sm:$0xff] }
 0x2c0   : > { %v1835_v62 = vpop.f32.mrf.mxu3  ;;  %v1903_v21 = vpop.f32.mrf.mxu0  ;;  %2061 = vmatpush.msra.mxu3 %v2012_v48 }
 0x2c1   : > { %v1836_v3 = vadd.f32 %v1835_v62, %v1822_v61  ;;  %v1995_v61 = vld [vmem:[#allocation6] sm:$0xff] }
 0x2c2   : > { %v2011_v62 = vld [vmem:[#allocation6 + $0x80] sm:$0xff]  ;;  %2042 = vmatpush.msra.mxu2 %v1995_v61 }
 0x2c3   : > { %v1850_v8 = vadd.f32 %v1849_v6, %v1836_v3  ;;  %v1877_v9 = vpop.f32.mrf.mxu2  ;;  %2062 = vmatpush.msra.mxu3 %v2011_v62 }
 0x2c4   : > { %v1917_v26 = vpop.f32.mrf.mxu1 }
 0x2c5   : > { %v1864_v18 = vadd.f32 %v1863_v63, %v1850_v8 }
 0x2c7   : > { %v1878_v12 = vadd.f32 %v1877_v9, %v1864_v18 }
 0x2c8   : > { %v1889_v13 = vpop.f32.mrf.mxu3  ;;  %v1905_v37 = vpop.f32.mrf.mxu0 }
 0x2c9   : > { %1969 = vmatpush.msra.mxu0 %v1878_v12  ;;  %v1890_v34 = vadd.f32 %v1889_v13, %v1407_v30 }
 0x2cb   : > { %1970 = vmatpush.msra.mxu0 %v1876_v15  ;;  %v1931_v33 = vpop.f32.mrf.mxu2  ;;  %v1904_v43 = vadd.f32 %v1903_v21, %v1890_v34 }
 0x2cc   : > { %2820 = vmatmul.msk.f32.vlgmr.msra.gmra.mxu0 %vm1951_vm5, %v3856_v16  ;;  %v1919_v46 = vpop.f32.mrf.mxu1 }
 0x2cd   : > { %v1918_v52 = vadd.f32 %v1917_v26, %v1904_v43 }
 0x2cf   : > { %v1932_v59 = vadd.f32 %v1931_v33, %v1918_v52 }
 0x2d0   : > { %v1891_v27 = vpop.f32.mrf.mxu3 }
 0x2d1   : > { %v1892_v4 = vadd.f32 %v1891_v27, %v1407_v30 }
 0x2d3   : > { %v1906_v39 = vadd.f32 %v1905_v37, %v1892_v4  ;;  %v1933_v54 = vpop.f32.mrf.mxu2 }
 0x2d5   : > { %v1920_v49 = vadd.f32 %v1919_v46, %v1906_v39 }
 0x2d7   : > { %v1934_v44 = vadd.f32 %v1933_v54, %v1920_v49 }
 0x2d8   : > { %v1945_v41 = vpop.f32.mrf.mxu3 }
 0x2d9   : > { %v1946_v60 = vadd.f32 %v1945_v41, %v1932_v59 }
 0x2e0   : > { %v1947_v2 = vpop.f32.mrf.mxu3 }
 0x2e1   : > { %v1948_v32 = vadd.f32 %v1947_v2, %v1934_v44 }
 0x2e3   : > { %1989 = vmatpush.msra.mxu1 %v1948_v32 }
 0x2e5   : > { %1990 = vmatpush.msra.mxu1 %v1946_v60 }
 0x2e6   : > { %2821 = vmatmul.msk.f32.vlgmr.msra.gmra.mxu1 %vm1951_vm5, %v3856_v16 }
 0x349   : > { %v1972_v1 = vpop.f32.mrf.mxu0 }
 0x34a   : > { %2043 = vmatmul.f32.vlgmr.msra.gmra.mxu2 %v1972_v1 }
 0x363   : > { %v1992_v3 = vpop.f32.mrf.mxu1 }
 0x364   : > { %2063 = vmatmul.f32.vlgmr.msra.gmra.mxu3 %v1992_v3 }
 0x3cd   : > { %v2044_v6 = vpop.f32.mrf.mxu2 }
 0x3e7   : > { %v2064_v8 = vpop.f32.mrf.mxu3 }
 0x3e8   : > { %v2065_v63 = vadd.f32 %v2064_v8, %v2044_v6 }
 0x3ea   : > { %v2067_v0 = vpack.c.bf16 %v2065_v63, %v2065_v63 }
 0x3ec   : > { %2068 = vst [vmem:[%s380_s29] sm:$0xf] %v2067_v0 }
 0x3ed PF: > { %s21_s30 = sadd.s32 1, %s3132_s30  }
 0x3ee   : > { %p18_p7 = scmp.ge.s32.totalorder %s21_s30, 4  }
 0x3f0   :  { %20 = sbr.rel (!%p18_p7) target bundleno = 2 (0x2), region = 99 }
 0x3f5   :  { %2088 = vsyncpa [#allocation3], 1 }
 0x3f6   :  { %2090 = vsyncpa [#allocation3 + $0x1], 1 }
 0x3f7   :  { %2091 = vsyncpa [#allocation5], 1 }

</bundles_post_ra>
